<compile_context>
chip_gen: v7x
topology: tpu7x:2x2x1
jax: 0.10.0
libtpu: 0.0.40
codegen_flags: <defaults>
</compile_context>

<pallas_src>
import functools

import jax
import jax.numpy as jnp
from jax import lax
from jax.experimental import pallas as pl
from jax.experimental.pallas import tpu as pltpu


# --------------------------- shared bucket helper ----------------------------
def _distance_buckets(dist, num_buckets):
    """floor(log2(dist+1)) clamped to num_buckets-1, via exact integer thresholds.

    Used identically inside the Pallas kernel and the pure-JAX reference so the
    bucketing is bit-identical (no transcendental boundary ambiguity).
    """
    bucket = jnp.zeros(dist.shape, dtype=jnp.int32)
    for k in range(1, num_buckets):
        bucket = bucket + (dist >= (2 ** k - 1)).astype(jnp.int32)
    return bucket


# ------------------------------- Pallas kernel -------------------------------
def _coref_pair_kernel(xi_ref, xj_ref, bi_ref, ej_ref, si_ref, sj_ref,
                       wlrp_ref, blrp_ref, w2_ref, b2_ref, wo_ref, bo_ref,
                       dtab_ref, out_ref):
    ti = xi_ref.shape[1]
    tj = xj_ref.shape[1]
    H = w2_ref.shape[0]
    NB = dtab_ref.shape[0]

    # Fused per-span projections: one [t, D] x [D, 3H] MXU matmul per side.
    lrp_i = jnp.dot(xi_ref[0], wlrp_ref[...],
                    preferred_element_type=jnp.float32) + blrp_ref[...]   # [ti, 3H]
    lrp_j = jnp.dot(xj_ref[0], wlrp_ref[...],
                    preferred_element_type=jnp.float32) + blrp_ref[...]   # [tj, 3H]
    l_i = lrp_i[:, :H]
    p_i = lrp_i[:, 2 * H:]
    r_j = lrp_j[:, H:2 * H]
    p_j = lrp_j[:, 2 * H:]

    # Distance contribution from the precomputed [NB, H] table (no [N,N,P] DMA).
    dist = jnp.abs(bi_ref[0] - ej_ref[0])                                 # [ti, tj] i32
    bucket = _distance_buckets(dist, NB)                                  # [ti, tj]
    onehot = (bucket[:, :, None] ==
              lax.broadcasted_iota(jnp.int32, (ti, tj, NB), 2)).astype(jnp.float32)
    de = jnp.dot(onehot.reshape(ti * tj, NB), dtab_ref[...],
                 preferred_element_type=jnp.float32).reshape(ti, tj, H)

    # Pairwise hidden: relu(l_i + r_j + p_i*p_j + dist_ij)   (f32 on the VPU)
    h = (l_i[:, None, :] + r_j[None, :, :]
         + p_i[:, None, :] * p_j[None, :, :] + de)                        # [ti, tj, H]
    h = jnp.maximum(h, 0.0)

    # layer2 + relu (MXU; operands in mxu dtype, f32 accumulation).
    h2 = jnp.dot(h.reshape(ti * tj, H).astype(w2_ref.dtype), w2_ref[...],
                 preferred_element_type=jnp.float32) + b2_ref[...]
    h2 = jnp.maximum(h2, 0.0).reshape(ti, tj, H)

    # Out projection (H -> 1) kept as VPU multiply + lane reduce (f32).
    s = jnp.sum(h2 * wo_ref[...][None, :, :], axis=-1) + bo_ref[0, 0]     # [ti, tj]

    # coref_add_scores: add prune scores of both spans, zero the diagonal.
    s = s + si_ref[0] + sj_ref[0]
    row = lax.broadcasted_iota(jnp.int32, (ti, tj), 0) + pl.program_id(1) * ti
    col = lax.broadcasted_iota(jnp.int32, (ti, tj), 1) + pl.program_id(2) * tj
    out_ref[0] = jnp.where(row == col, jnp.float32(0.0), s)


# --------------------------------- wrapper ------------------------------------
def _pick_tiles(N, H):
    # j-tile is the output lane dimension: full N, or a multiple of 128 for
    # lane-dense stores once N is large enough.
    tj = 128 if (N % 128 == 0 and N >= 128) else N
    # i-tile: multiple of 8 dividing N, keeping the [ti, tj, H] f32 hidden
    # tile around a couple of MiB.
    ti = N
    budget = max(8, (2 * 1024 * 1024) // max(1, tj * H * 4))
    for cand in (256, 128, 64, 32, 16, 8):
        if cand <= budget and N % cand == 0:
            ti = cand
            break
    return ti, tj


def coref_pairwise_scores_pallas(span_vecs, span_begin, span_end, span_scores,
                                 params, *, ti=None, tj=None,
                                 mxu_dtype=jnp.bfloat16,
                                 vmem_limit_bytes=48 * 1024 * 1024):
    B, N, D = span_vecs.shape
    H = params["w_l2"].shape[0]
    hp = lax.Precision.HIGHEST

    auto_ti, auto_tj = _pick_tiles(N, H)
    ti = auto_ti if ti is None else ti
    tj = auto_tj if tj is None else tj
    assert N % ti == 0 and N % tj == 0, "pair tiles must divide N"
    assert ti == N or ti % 8 == 0
    assert tj == N or tj % 128 == 0

    # Wrapper-side precompute / packing (all O(D*H) or O(B*N): negligible).
    w_lrp = jnp.concatenate(
        [params["w_left"], params["w_right"], params["w_prod"]], axis=1
    ).astype(mxu_dtype)                                                    # [D, 3H]
    b_lrp = jnp.concatenate(
        [params["b_left"], params["b_right"], params["b_prod"]], axis=1
    ).astype(jnp.float32)                                                  # [1, 3H]
    w2 = params["w_l2"].astype(mxu_dtype)                                  # [H, H]
    b2 = params["b_l2"].astype(jnp.float32)                                # [1, H]
    wo = params["w_out"].astype(jnp.float32)                               # [1, H]
    bo = params["b_out"].astype(jnp.float32)                               # [1, 1]
    dist_table = (jnp.dot(params["dist_emb"], params["w_dist"], precision=hp)
                  + params["b_dist"]).astype(jnp.float32)                  # [NB, H]

    x = span_vecs.astype(mxu_dtype)                                        # [B, N, D]
    begin_i = span_begin.astype(jnp.int32)[:, :, None]                     # [B, N, 1]
    end_j = span_end.astype(jnp.int32)[:, None, :]                         # [B, 1, N]
    scores_i = span_scores.astype(jnp.float32)                             # [B, N, 1]
    scores_j = jnp.transpose(scores_i, (0, 2, 1))                          # [B, 1, N]

    # NOTE: on v7x with very large D/H, add pipeline_mode=pl.Buffered(1) to the
    # constant-index weight specs to avoid double-buffered weight copies.
    def const_spec(arr):
        zeros = (0,) * arr.ndim
        return pl.BlockSpec(arr.shape, lambda b, i, j, _z=zeros: _z)

    weights = (w_lrp, b_lrp, w2, b2, wo, bo, dist_table)

    grid_spec = pltpu.PrefetchScalarGridSpec(
        num_scalar_prefetch=0,
        grid=(B, N // ti, N // tj),
        in_specs=[
            pl.BlockSpec((1, ti, D), lambda b, i, j: (b, i, 0)),   # x_i
            pl.BlockSpec((1, tj, D), lambda b, i, j: (b, j, 0)),   # x_j
            pl.BlockSpec((1, ti, 1), lambda b, i, j: (b, i, 0)),   # begin_i
            pl.BlockSpec((1, 1, tj), lambda b, i, j: (b, 0, j)),   # end_j
            pl.BlockSpec((1, ti, 1), lambda b, i, j: (b, i, 0)),   # score_i
            pl.BlockSpec((1, 1, tj), lambda b, i, j: (b, 0, j)),   # score_j
        ] + [const_spec(w) for w in weights],
        out_specs=pl.BlockSpec((1, ti, tj), lambda b, i, j: (b, i, j)),
    )

    return pl.pallas_call(
        _coref_pair_kernel,
        out_shape=jax.ShapeDtypeStruct((B, N, N), jnp.float32),
        grid_spec=grid_spec,
        compiler_params=pltpu.CompilerParams(
            dimension_semantics=("parallel", "parallel", "parallel"),
            vmem_limit_bytes=vmem_limit_bytes),
    )(x, x, begin_i, end_j, scores_i, scores_j, *weights)


def module_coref_scorer_forward(all_spans, filtered_spans, sequence_lengths,
                                params, **kw):
    """Mirrors ModuleCorefScorer.forward (coref_prop=0 / eval-mode path)."""
    coref_scores = coref_pairwise_scores_pallas(
        filtered_spans["span_vecs"], filtered_spans["span_begin"],
        filtered_spans["span_end"], filtered_spans["span_scores"], params, **kw)
    update_all = dict(all_spans)
    update_filtered = dict(filtered_spans)
    return update_all, update_filtered, coref_scores


# ----------------------------- pure-JAX reference -----------------------------
def _reference_scores(span_vecs, span_begin, span_end, span_scores, params):
    hp = lax.Precision.HIGHEST
    dot = functools.partial(jnp.dot, precision=hp)
    NB = params["dist_emb"].shape[0]
    dist = jnp.abs(span_begin[:, :, None].astype(jnp.int32)
                   - span_end[:, None, :].astype(jnp.int32))               # [B,N,N]
    buckets = _distance_buckets(dist, NB)
    dist_feat = params["dist_emb"][buckets]                                # [B,N,N,P]
    l = dot(span_vecs, params["w_left"]) + params["b_left"]                # [B,N,H]
    r = dot(span_vecs, params["w_right"]) + params["b_right"]
    p = dot(span_vecs, params["w_prod"]) + params["b_prod"]
    de = dot(dist_feat, params["w_dist"]) + params["b_dist"]               # [B,N,N,H]
    h = jax.nn.relu(l[:, :, None, :] + r[:, None, :, :]
                    + p[:, :, None, :] * p[:, None, :, :] + de)
    h2 = jax.nn.relu(dot(h, params["w_l2"]) + params["b_l2"])
    s = (dot(h2, params["w_out"].T) + params["b_out"])[..., 0]             # [B,N,N]
    s = s + span_scores + jnp.transpose(span_scores, (0, 2, 1))
    eye = jnp.eye(s.shape[1], dtype=s.dtype)[None]
    return s * (1.0 - eye)


# ----------------------------------- main --------------------------------------
def _init_params(key, D, H, P, num_buckets):
    keys = jax.random.split(key, 12)
    n = lambda k, shape, scale=0.05: (scale * jax.random.normal(k, shape)).astype(jnp.float32)
    return {
        "w_left":  n(keys[0], (D, H)),  "b_left":  n(keys[1], (1, H)),
        "w_right": n(keys[2], (D, H)),  "b_right": n(keys[3], (1, H)),
        "w_prod":  n(keys[4], (D, H)),  "b_prod":  n(keys[5], (1, H)),
        "w_dist":  n(keys[6], (P, H)),  "b_dist":  n(keys[7], (1, H)),
        "w_l2":    n(keys[8], (H, H)),  "b_l2":    n(keys[9], (1, H)),
        "w_out":   n(keys[10], (1, H)), "b_out":   n(keys[11], (1, 1)),
        "dist_emb": n(jax.random.fold_in(key, 99), (num_buckets, P)),
    }


if __name__ == "__main__":
    B, N, D, H, P = 2, 16, 32, 32, 16
    num_buckets = 10

    key = jax.random.PRNGKey(0)
    k_vec, k_beg, k_len, k_sc, k_all, k_par = jax.random.split(key, 6)

    span_vecs = jax.random.normal(k_vec, (B, N, D), dtype=jnp.float32)
    span_begin = jax.random.randint(k_beg, (B, N), 0, 40)
    span_end = span_begin + jax.random.randint(k_len, (B, N), 0, 5)
    span_scores = jax.random.normal(k_sc, (B, N, 1), dtype=jnp.float32)
    sequence_lengths = jnp.array([48, 44], dtype=jnp.int32)

    all_spans = {"span_vecs": jax.random.normal(k_all, (B, 2 * N, D), dtype=jnp.float32)}
    filtered_spans = {
        "span_vecs": span_vecs,
        "span_begin": span_begin,
        "span_end": span_end,
        "span_scores": span_scores,
    }

    params = _init_params(k_par, D, H, P, num_buckets)

    # Default path: bf16 MXU operands; ti=8 so the (B, N/ti, N/tj) grid tiling
    # is actually exercised (grid = (2, 2, 1)).
    update_all, update_filtered, coref_scores = module_coref_scorer_forward(
        all_spans, filtered_spans, sequence_lengths, params, ti=8)
    coref_scores = jax.block_until_ready(coref_scores)

    ref = _reference_scores(span_vecs, span_begin, span_end, span_scores, params)
    assert coref_scores.shape == (B, N, N)
    assert bool(jnp.all(jnp.isfinite(coref_scores)))
    assert bool(jnp.allclose(coref_scores, ref, rtol=3e-2, atol=3e-2)), (
        float(jnp.max(jnp.abs(coref_scores - ref))))

    # f32-operand path (v5e-style) at a tighter tolerance.
    _, _, coref_f32 = module_coref_scorer_forward(
        all_spans, filtered_spans, sequence_lengths, params,
        ti=8, mxu_dtype=jnp.float32)
    coref_f32 = jax.block_until_ready(coref_f32)
    assert bool(jnp.allclose(coref_f32, ref, rtol=2e-2, atol=2e-2)), (
        float(jnp.max(jnp.abs(coref_f32 - ref))))

    print("KERNEL_OK")
</pallas_src>

<mosaic_0001>
module attributes {stable_mosaic.version = 11 : i64} {
  func.func @_coref_pair_kernel(%arg0: i32, %arg1: i32, %arg2: i32, %arg3: memref<1x8x32xbf16, #tpu.memory_space<vmem>>, %arg4: memref<1x16x32xbf16, #tpu.memory_space<vmem>>, %arg5: memref<1x8x1xi32, #tpu.memory_space<vmem>>, %arg6: memref<1x1x16xi32, #tpu.memory_space<vmem>>, %arg7: memref<1x8x1xf32, #tpu.memory_space<vmem>>, %arg8: memref<1x1x16xf32, #tpu.memory_space<vmem>>, %arg9: memref<32x96xbf16, #tpu.memory_space<vmem>>, %arg10: memref<1x96xf32, #tpu.memory_space<vmem>>, %arg11: memref<32x32xbf16, #tpu.memory_space<vmem>>, %arg12: memref<1x32xf32, #tpu.memory_space<vmem>>, %arg13: memref<1x32xf32, #tpu.memory_space<vmem>>, %arg14: memref<1x1xf32, #tpu.memory_space<vmem>>, %arg15: memref<10x32xf32, #tpu.memory_space<vmem>>, %arg16: memref<1x8x16xf32, #tpu.memory_space<vmem>>) attributes {dimension_semantics = [#tpu.dimension_semantics<parallel>, #tpu.dimension_semantics<parallel>, #tpu.dimension_semantics<parallel>], iteration_bounds = array<i64: 2, 2, 1>, scalar_prefetch = 0 : i64, scratch_operands = 0 : i64, tpu.core_type = #tpu.core_type<tc>, window_params = [{transform_indices = @transform_0, window_bounds = array<i64: 1, 8, 32>}, {transform_indices = @transform_1, window_bounds = array<i64: 1, 16, 32>}, {transform_indices = @transform_2, window_bounds = array<i64: 1, 8, 1>}, {transform_indices = @transform_3, window_bounds = array<i64: 1, 1, 16>}, {transform_indices = @transform_4, window_bounds = array<i64: 1, 8, 1>}, {transform_indices = @transform_5, window_bounds = array<i64: 1, 1, 16>}, {pipeline_mode = #tpu.pipeline_mode<synchronous>, transform_indices = @transform_6, window_bounds = array<i64: 32, 96>}, {pipeline_mode = #tpu.pipeline_mode<synchronous>, transform_indices = @transform_7, window_bounds = array<i64: 1, 96>}, {pipeline_mode = #tpu.pipeline_mode<synchronous>, transform_indices = @transform_8, window_bounds = array<i64: 32, 32>}, {pipeline_mode = #tpu.pipeline_mode<synchronous>, transform_indices = @transform_9, window_bounds = array<i64: 1, 32>}, {pipeline_mode = #tpu.pipeline_mode<synchronous>, transform_indices = @transform_10, window_bounds = array<i64: 1, 32>}, {pipeline_mode = #tpu.pipeline_mode<synchronous>, transform_indices = @transform_11, window_bounds = array<i64: 1, 1>}, {pipeline_mode = #tpu.pipeline_mode<synchronous>, transform_indices = @transform_12, window_bounds = array<i64: 10, 32>}, {transform_indices = @transform_13, window_bounds = array<i64: 1, 8, 16>}]} {
    %c0 = arith.constant 0 : index
    %c0_0 = arith.constant 0 : index
    %c0_1 = arith.constant 0 : index
    %0 = vector.load %arg3[%c0, %c0_0, %c0_1] : memref<1x8x32xbf16, #tpu.memory_space<vmem>>, vector<1x8x32xbf16>
    %1 = vector.shape_cast %0 : vector<1x8x32xbf16> to vector<8x32xbf16>
    %c0_2 = arith.constant 0 : index
    %c0_3 = arith.constant 0 : index
    %2 = vector.load %arg9[%c0_2, %c0_3] : memref<32x96xbf16, #tpu.memory_space<vmem>>, vector<32x96xbf16>
    %cst = arith.constant dense<0.000000e+00> : vector<8x96xf32>
    %3 = tpu.matmul %1, %2, %cst {dimension_numbers = #tpu.dot_dimension_numbers<[1], [0], [0], [1], [0, 0, 1, 1], [], []>} : vector<8x32xbf16>, vector<32x96xbf16>, vector<8x96xf32> -> vector<8x96xf32>
    %c0_4 = arith.constant 0 : index
    %c0_5 = arith.constant 0 : index
    %4 = vector.load %arg10[%c0_4, %c0_5] : memref<1x96xf32, #tpu.memory_space<vmem>>, vector<1x96xf32>
    %5 = vector.broadcast %4 : vector<1x96xf32> to vector<8x96xf32>
    %6 = arith.addf %3, %5 : vector<8x96xf32>
    %c0_6 = arith.constant 0 : index
    %c0_7 = arith.constant 0 : index
    %c0_8 = arith.constant 0 : index
    %7 = vector.load %arg4[%c0_6, %c0_7, %c0_8] : memref<1x16x32xbf16, #tpu.memory_space<vmem>>, vector<1x16x32xbf16>
    %8 = vector.shape_cast %7 : vector<1x16x32xbf16> to vector<16x32xbf16>
    %c0_9 = arith.constant 0 : index
    %c0_10 = arith.constant 0 : index
    %9 = vector.load %arg9[%c0_9, %c0_10] : memref<32x96xbf16, #tpu.memory_space<vmem>>, vector<32x96xbf16>
    %cst_11 = arith.constant dense<0.000000e+00> : vector<16x96xf32>
    %10 = tpu.matmul %8, %9, %cst_11 {dimension_numbers = #tpu.dot_dimension_numbers<[1], [0], [0], [1], [0, 0, 1, 1], [], []>} : vector<16x32xbf16>, vector<32x96xbf16>, vector<16x96xf32> -> vector<16x96xf32>
    %c0_12 = arith.constant 0 : index
    %c0_13 = arith.constant 0 : index
    %11 = vector.load %arg10[%c0_12, %c0_13] : memref<1x96xf32, #tpu.memory_space<vmem>>, vector<1x96xf32>
    %12 = vector.broadcast %11 : vector<1x96xf32> to vector<16x96xf32>
    %13 = arith.addf %10, %12 : vector<16x96xf32>
    %14 = vector.extract_strided_slice %6 {offsets = [0, 0], sizes = [8, 32], strides = [1, 1]} : vector<8x96xf32> to vector<8x32xf32>
    %15 = vector.extract_strided_slice %6 {offsets = [0, 64], sizes = [8, 32], strides = [1, 1]} : vector<8x96xf32> to vector<8x32xf32>
    %16 = vector.extract_strided_slice %13 {offsets = [0, 32], sizes = [16, 32], strides = [1, 1]} : vector<16x96xf32> to vector<16x32xf32>
    %17 = vector.extract_strided_slice %13 {offsets = [0, 64], sizes = [16, 32], strides = [1, 1]} : vector<16x96xf32> to vector<16x32xf32>
    %c0_14 = arith.constant 0 : index
    %c0_15 = arith.constant 0 : index
    %c0_16 = arith.constant 0 : index
    %18 = vector.load %arg5[%c0_14, %c0_15, %c0_16] : memref<1x8x1xi32, #tpu.memory_space<vmem>>, vector<1x8x1xi32>
    %19 = vector.shape_cast %18 : vector<1x8x1xi32> to vector<8x1xi32>
    %c0_17 = arith.constant 0 : index
    %c0_18 = arith.constant 0 : index
    %c0_19 = arith.constant 0 : index
    %20 = vector.load %arg6[%c0_17, %c0_18, %c0_19] : memref<1x1x16xi32, #tpu.memory_space<vmem>>, vector<1x1x16xi32>
    %21 = vector.shape_cast %20 : vector<1x1x16xi32> to vector<1x16xi32>
    %22 = vector.broadcast %19 : vector<8x1xi32> to vector<8x16xi32>
    %23 = vector.broadcast %21 : vector<1x16xi32> to vector<8x16xi32>
    %24 = arith.subi %22, %23 : vector<8x16xi32>
    %25 = math.absi %24 : vector<8x16xi32>
    %c0_i32 = arith.constant 0 : i32
    %26 = vector.broadcast %c0_i32 : i32 to vector<8x16xi32>
    %c1_i32 = arith.constant 1 : i32
    %27 = vector.broadcast %c1_i32 : i32 to vector<8x16xi32>
    %28 = arith.cmpi sge, %25, %27 : vector<8x16xi32>
    %29 = arith.extui %28 : vector<8x16xi1> to vector<8x16xi32>
    %30 = arith.addi %26, %29 : vector<8x16xi32>
    %c3_i32 = arith.constant 3 : i32
    %31 = vector.broadcast %c3_i32 : i32 to vector<8x16xi32>
    %32 = arith.cmpi sge, %25, %31 : vector<8x16xi32>
    %33 = arith.extui %32 : vector<8x16xi1> to vector<8x16xi32>
    %34 = arith.addi %30, %33 : vector<8x16xi32>
    %c7_i32 = arith.constant 7 : i32
    %35 = vector.broadcast %c7_i32 : i32 to vector<8x16xi32>
    %36 = arith.cmpi sge, %25, %35 : vector<8x16xi32>
    %37 = arith.extui %36 : vector<8x16xi1> to vector<8x16xi32>
    %38 = arith.addi %34, %37 : vector<8x16xi32>
    %c15_i32 = arith.constant 15 : i32
    %39 = vector.broadcast %c15_i32 : i32 to vector<8x16xi32>
    %40 = arith.cmpi sge, %25, %39 : vector<8x16xi32>
    %41 = arith.extui %40 : vector<8x16xi1> to vector<8x16xi32>
    %42 = arith.addi %38, %41 : vector<8x16xi32>
    %c31_i32 = arith.constant 31 : i32
    %43 = vector.broadcast %c31_i32 : i32 to vector<8x16xi32>
    %44 = arith.cmpi sge, %25, %43 : vector<8x16xi32>
    %45 = arith.extui %44 : vector<8x16xi1> to vector<8x16xi32>
    %46 = arith.addi %42, %45 : vector<8x16xi32>
    %c63_i32 = arith.constant 63 : i32
    %47 = vector.broadcast %c63_i32 : i32 to vector<8x16xi32>
    %48 = arith.cmpi sge, %25, %47 : vector<8x16xi32>
    %49 = arith.extui %48 : vector<8x16xi1> to vector<8x16xi32>
    %50 = arith.addi %46, %49 : vector<8x16xi32>
    %c127_i32 = arith.constant 127 : i32
    %51 = vector.broadcast %c127_i32 : i32 to vector<8x16xi32>
    %52 = arith.cmpi sge, %25, %51 : vector<8x16xi32>
    %53 = arith.extui %52 : vector<8x16xi1> to vector<8x16xi32>
    %54 = arith.addi %50, %53 : vector<8x16xi32>
    %c255_i32 = arith.constant 255 : i32
    %55 = vector.broadcast %c255_i32 : i32 to vector<8x16xi32>
    %56 = arith.cmpi sge, %25, %55 : vector<8x16xi32>
    %57 = arith.extui %56 : vector<8x16xi1> to vector<8x16xi32>
    %58 = arith.addi %54, %57 : vector<8x16xi32>
    %c511_i32 = arith.constant 511 : i32
    %59 = vector.broadcast %c511_i32 : i32 to vector<8x16xi32>
    %60 = arith.cmpi sge, %25, %59 : vector<8x16xi32>
    %61 = arith.extui %60 : vector<8x16xi1> to vector<8x16xi32>
    %62 = arith.addi %58, %61 : vector<8x16xi32>
    %63 = vector.shape_cast %62 : vector<8x16xi32> to vector<8x16x1xi32>
    %64 = tpu.iota {dimensions = array<i32: 2>} : vector<8x16x10xi32>
    %65 = vector.broadcast %63 : vector<8x16x1xi32> to vector<8x16x10xi32>
    %66 = arith.cmpi eq, %65, %64 : vector<8x16x10xi32>
    %67 = arith.extui %66 : vector<8x16x10xi1> to vector<8x16x10xi32>
    %68 = arith.sitofp %67 : vector<8x16x10xi32> to vector<8x16x10xf32>
    %69 = vector.shape_cast %68 : vector<8x16x10xf32> to vector<128x10xf32>
    %c0_20 = arith.constant 0 : index
    %c0_21 = arith.constant 0 : index
    %70 = vector.load %arg15[%c0_20, %c0_21] : memref<10x32xf32, #tpu.memory_space<vmem>>, vector<10x32xf32>
    %cst_22 = arith.constant dense<0.000000e+00> : vector<128x32xf32>
    %71 = tpu.matmul %69, %70, %cst_22 {dimension_numbers = #tpu.dot_dimension_numbers<[1], [0], [0], [1], [0, 0, 1, 1], [], []>} : vector<128x10xf32>, vector<10x32xf32>, vector<128x32xf32> -> vector<128x32xf32>
    %72 = vector.shape_cast %71 : vector<128x32xf32> to vector<8x16x32xf32>
    %73 = vector.shape_cast %14 : vector<8x32xf32> to vector<8x1x32xf32>
    %74 = vector.shape_cast %16 : vector<16x32xf32> to vector<1x16x32xf32>
    %75 = vector.broadcast %73 : vector<8x1x32xf32> to vector<8x16x32xf32>
    %76 = vector.broadcast %74 : vector<1x16x32xf32> to vector<8x16x32xf32>
    %77 = arith.addf %75, %76 : vector<8x16x32xf32>
    %78 = vector.shape_cast %15 : vector<8x32xf32> to vector<8x1x32xf32>
    %79 = vector.shape_cast %17 : vector<16x32xf32> to vector<1x16x32xf32>
    %80 = vector.broadcast %78 : vector<8x1x32xf32> to vector<8x16x32xf32>
    %81 = vector.broadcast %79 : vector<1x16x32xf32> to vector<8x16x32xf32>
    %82 = arith.mulf %80, %81 : vector<8x16x32xf32>
    %83 = arith.addf %77, %82 : vector<8x16x32xf32>
    %84 = arith.addf %83, %72 : vector<8x16x32xf32>
    %cst_23 = arith.constant 0.000000e+00 : f32
    %85 = vector.broadcast %cst_23 : f32 to vector<8x16x32xf32>
    %86 = arith.maximumf %84, %85 : vector<8x16x32xf32>
    %87 = vector.shape_cast %86 : vector<8x16x32xf32> to vector<128x32xf32>
    %88 = arith.truncf %87 : vector<128x32xf32> to vector<128x32xbf16>
    %c0_24 = arith.constant 0 : index
    %c0_25 = arith.constant 0 : index
    %89 = vector.load %arg11[%c0_24, %c0_25] : memref<32x32xbf16, #tpu.memory_space<vmem>>, vector<32x32xbf16>
    %cst_26 = arith.constant dense<0.000000e+00> : vector<128x32xf32>
    %90 = tpu.matmul %88, %89, %cst_26 {dimension_numbers = #tpu.dot_dimension_numbers<[1], [0], [0], [1], [0, 0, 1, 1], [], []>} : vector<128x32xbf16>, vector<32x32xbf16>, vector<128x32xf32> -> vector<128x32xf32>
    %c0_27 = arith.constant 0 : index
    %c0_28 = arith.constant 0 : index
    %91 = vector.load %arg12[%c0_27, %c0_28] : memref<1x32xf32, #tpu.memory_space<vmem>>, vector<1x32xf32>
    %92 = vector.broadcast %91 : vector<1x32xf32> to vector<128x32xf32>
    %93 = arith.addf %90, %92 : vector<128x32xf32>
    %cst_29 = arith.constant 0.000000e+00 : f32
    %94 = vector.broadcast %cst_29 : f32 to vector<128x32xf32>
    %95 = arith.maximumf %93, %94 : vector<128x32xf32>
    %96 = vector.shape_cast %95 : vector<128x32xf32> to vector<8x16x32xf32>
    %c0_30 = arith.constant 0 : index
    %c0_31 = arith.constant 0 : index
    %97 = vector.load %arg13[%c0_30, %c0_31] : memref<1x32xf32, #tpu.memory_space<vmem>>, vector<1x32xf32>
    %98 = vector.shape_cast %97 : vector<1x32xf32> to vector<1x1x32xf32>
    %99 = vector.broadcast %98 : vector<1x1x32xf32> to vector<8x16x32xf32>
    %100 = arith.mulf %96, %99 : vector<8x16x32xf32>
    %cst_32 = arith.constant dense<0.000000e+00> : vector<8x16xf32>
    %101 = vector.multi_reduction <add>, %100, %cst_32 [2] : vector<8x16x32xf32> to vector<8x16xf32>
    %c0_33 = arith.constant 0 : index
    %c0_34 = arith.constant 0 : index
    %102 = vector.load %arg14[%c0_33, %c0_34] : memref<1x1xf32, #tpu.memory_space<vmem>>, vector<1x1xf32>
    %103 = vector.extract %102[0, 0] : f32 from vector<1x1xf32>
    %104 = vector.broadcast %103 : f32 to vector<8x16xf32>
    %105 = arith.addf %101, %104 : vector<8x16xf32>
    %c0_35 = arith.constant 0 : index
    %c0_36 = arith.constant 0 : index
    %c0_37 = arith.constant 0 : index
    %106 = vector.load %arg7[%c0_35, %c0_36, %c0_37] : memref<1x8x1xf32, #tpu.memory_space<vmem>>, vector<1x8x1xf32>
    %107 = vector.shape_cast %106 : vector<1x8x1xf32> to vector<8x1xf32>
    %108 = vector.broadcast %107 : vector<8x1xf32> to vector<8x16xf32>
    %109 = arith.addf %105, %108 : vector<8x16xf32>
    %c0_38 = arith.constant 0 : index
    %c0_39 = arith.constant 0 : index
    %c0_40 = arith.constant 0 : index
    %110 = vector.load %arg8[%c0_38, %c0_39, %c0_40] : memref<1x1x16xf32, #tpu.memory_space<vmem>>, vector<1x1x16xf32>
    %111 = vector.shape_cast %110 : vector<1x1x16xf32> to vector<1x16xf32>
    %112 = vector.broadcast %111 : vector<1x16xf32> to vector<8x16xf32>
    %113 = arith.addf %109, %112 : vector<8x16xf32>
    %114 = tpu.iota {dimensions = array<i32: 0>} : vector<8x16xi32>
    %c8_i32 = arith.constant 8 : i32
    %115 = arith.muli %arg1, %c8_i32 : i32
    %116 = vector.broadcast %115 : i32 to vector<8x16xi32>
    %117 = arith.addi %114, %116 : vector<8x16xi32>
    %118 = tpu.iota {dimensions = array<i32: 1>} : vector<8x16xi32>
    %c16_i32 = arith.constant 16 : i32
    %119 = arith.muli %arg2, %c16_i32 : i32
    %120 = vector.broadcast %119 : i32 to vector<8x16xi32>
    %121 = arith.addi %118, %120 : vector<8x16xi32>
    %122 = arith.cmpi eq, %117, %121 : vector<8x16xi32>
    %cst_41 = arith.constant 0.000000e+00 : f32
    %123 = vector.broadcast %cst_41 : f32 to vector<8x16xf32>
    %124 = arith.select %122, %123, %113 : vector<8x16xi1>, vector<8x16xf32>
    %c0_42 = arith.constant 0 : index
    %c0_43 = arith.constant 0 : index
    %c0_44 = arith.constant 0 : index
    %125 = vector.load %arg16[%c0_42, %c0_43, %c0_44] : memref<1x8x16xf32, #tpu.memory_space<vmem>>, vector<1x8x16xf32>
    %126 = vector.shape_cast %125 : vector<1x8x16xf32> to vector<8x16xf32>
    %127 = vector.shape_cast %124 : vector<8x16xf32> to vector<1x8x16xf32>
    tpu.vector_store %arg16[%c0_42, %c0_43, %c0_44], %127 {strides = array<i32>} : memref<1x8x16xf32, #tpu.memory_space<vmem>>, vector<1x8x16xf32>,
    return
  }
  func.func @transform_0(%arg0: i32, %arg1: i32, %arg2: i32) -> (i32, i32, i32) {
    %c0_i32 = arith.constant 0 : i32
    %c0_i32_0 = arith.constant 0 : i32
    return %arg0, %arg1, %c0_i32 : i32, i32, i32
  }
  func.func @transform_1(%arg0: i32, %arg1: i32, %arg2: i32) -> (i32, i32, i32) {
    %c0_i32 = arith.constant 0 : i32
    %c0_i32_0 = arith.constant 0 : i32
    return %arg0, %arg2, %c0_i32 : i32, i32, i32
  }
  func.func @transform_2(%arg0: i32, %arg1: i32, %arg2: i32) -> (i32, i32, i32) {
    %c0_i32 = arith.constant 0 : i32
    %c0_i32_0 = arith.constant 0 : i32
    return %arg0, %arg1, %c0_i32 : i32, i32, i32
  }
  func.func @transform_3(%arg0: i32, %arg1: i32, %arg2: i32) -> (i32, i32, i32) {
    %c0_i32 = arith.constant 0 : i32
    %c0_i32_0 = arith.constant 0 : i32
    return %arg0, %c0_i32, %arg2 : i32, i32, i32
  }
  func.func @transform_4(%arg0: i32, %arg1: i32, %arg2: i32) -> (i32, i32, i32) {
    %c0_i32 = arith.constant 0 : i32
    %c0_i32_0 = arith.constant 0 : i32
    return %arg0, %arg1, %c0_i32 : i32, i32, i32
  }
  func.func @transform_5(%arg0: i32, %arg1: i32, %arg2: i32) -> (i32, i32, i32) {
    %c0_i32 = arith.constant 0 : i32
    %c0_i32_0 = arith.constant 0 : i32
    return %arg0, %c0_i32, %arg2 : i32, i32, i32
  }
  func.func @transform_6(%arg0: i32, %arg1: i32, %arg2: i32) -> (i32, i32) {
    %c0_i32 = arith.constant 0 : i32
    %c0_i32_0 = arith.constant 0 : i32
    %c0_i32_1 = arith.constant 0 : i32
    return %c0_i32, %c0_i32_0 : i32, i32
  }
  func.func @transform_7(%arg0: i32, %arg1: i32, %arg2: i32) -> (i32, i32) {
    %c0_i32 = arith.constant 0 : i32
    %c0_i32_0 = arith.constant 0 : i32
    %c0_i32_1 = arith.constant 0 : i32
    return %c0_i32, %c0_i32_0 : i32, i32
  }
  func.func @transform_8(%arg0: i32, %arg1: i32, %arg2: i32) -> (i32, i32) {
    %c0_i32 = arith.constant 0 : i32
    %c0_i32_0 = arith.constant 0 : i32
    %c0_i32_1 = arith.constant 0 : i32
    return %c0_i32, %c0_i32_0 : i32, i32
  }
  func.func @transform_9(%arg0: i32, %arg1: i32, %arg2: i32) -> (i32, i32) {
    %c0_i32 = arith.constant 0 : i32
    %c0_i32_0 = arith.constant 0 : i32
    %c0_i32_1 = arith.constant 0 : i32
    return %c0_i32, %c0_i32_0 : i32, i32
  }
  func.func @transform_10(%arg0: i32, %arg1: i32, %arg2: i32) -> (i32, i32) {
    %c0_i32 = arith.constant 0 : i32
    %c0_i32_0 = arith.constant 0 : i32
    %c0_i32_1 = arith.constant 0 : i32
    return %c0_i32, %c0_i32_0 : i32, i32
  }
  func.func @transform_11(%arg0: i32, %arg1: i32, %arg2: i32) -> (i32, i32) {
    %c0_i32 = arith.constant 0 : i32
    %c0_i32_0 = arith.constant 0 : i32
    %c0_i32_1 = arith.constant 0 : i32
    return %c0_i32, %c0_i32_0 : i32, i32
  }
  func.func @transform_12(%arg0: i32, %arg1: i32, %arg2: i32) -> (i32, i32) {
    %c0_i32 = arith.constant 0 : i32
    %c0_i32_0 = arith.constant 0 : i32
    %c0_i32_1 = arith.constant 0 : i32
    return %c0_i32, %c0_i32_0 : i32, i32
  }
  func.func @transform_13(%arg0: i32, %arg1: i32, %arg2: i32) -> (i32, i32, i32) {
    %c0_i32 = arith.constant 0 : i32
    return %arg0, %arg1, %arg2 : i32, i32, i32
  }
}

</mosaic_0001>

<bundles_post_ra>
// kernel: tpu_custom_call.1
= control target key start
LH: loop header
LB: loop body
LE: loop exit
PB: predicated region body
PF: predicated region fallthrough
CT: control target
= control target key end

     0   :  { %s3002_s0 = inlined_call_operand.vmem [shape: bf16[2,16,32], index: 0, kind: input, shape index: {}]   ;;  %s3003_s1 = inlined_call_operand.vmem [shape: bf16[2,16,32], index: 1, kind: input, shape index: {}]   ;;  %s3004_s2 = inlined_call_operand.vmem [shape: s32[2,16,1], index: 2, kind: input, shape index: {}]   ;;  %s3005_s3 = inlined_call_operand.vmem [shape: s32[2,1,16], index: 3, kind: input, shape index: {}]   ;;  %s3006_s4 = inlined_call_operand.vmem [shape: f32[2,16,1], index: 4, kind: input, shape index: {}]   ;;  %s3007_s5 = inlined_call_operand.vmem [shape: f32[2,1,16], index: 5, kind: input, shape index: {}]   ;;  %s3008_s6 = inlined_call_operand.vmem [shape: bf16[32,96], index: 6, kind: input, shape index: {}]   ;;  %s3009_s7 = inlined_call_operand.vmem [shape: f32[1,96], index: 7, kind: input, shape index: {}]   ;;  %s3010_s8 = inlined_call_operand.vmem [shape: bf16[32,32], index: 8, kind: input, shape index: {}]   ;;  %s3011_s9 = inlined_call_operand.vmem [shape: f32[1,32], index: 9, kind: input, shape index: {}]   ;;  %s3012_s10 = inlined_call_operand.vmem [shape: f32[1,32], index: 10, kind: input, shape index: {}]   ;;  %s3013_s11 = inlined_call_operand.<no memory space> [shape: f32[1,1], index: 11, kind: input, shape index: {}]   ;;  %s3014_s12 = inlined_call_operand.vmem [shape: f32[10,32], index: 12, kind: input, shape index: {}]   ;;  %s3015_s13 = inlined_call_operand.hbm [shape: f32[2,16,16], index: 13, kind: output, shape index: {}]  }
   0x1   :  { %3024 = sst [smem:[#allocation14_spill]] %s3008_s6  ;;  %v18_v0 = vstv %s3013_s11 }
   0x2   :  { %19 = vst [vmem:[#allocation2] sm:$0x1] %v18_v0 }
   0x3   :  { %20 = vsyncpa [#allocation4], 0 }
   0x4   :  { %22 = vsyncpa [#allocation4 + $0x1], 0  ;;  %s2497_s27 = smov 0   ;;  %s2499_s28 = smov 0  }
   0x5   :  { %s2501_s29 = smov 0   ;;  %s2503_s30 = smov 0  }
   0x6   :  { %s2505_s14 = smov 0   ;;  %s2507_s15 = smov 0  }
   0x7   :  { %s2509_s16 = smov 0   ;;  %s2511_s17 = smov 0  }
   0x8 LB: > { %3025 = sst [smem:[#allocation6_spill]] %s2386_s27  ;;  %s2054_s11 = sadd.s32 4294967295, %s2414_s17   ;;  %s2414_s17 = sphi %s2511_s17, %s28_s17   ;;  %s2410_s16 = sphi %s2509_s16, %s3044_s16   ;;  %s2406_s15 = sphi %s2507_s15, %s3043_s15   ;;  %s2402_s14 = sphi %s2505_s14, %s3042_s14   ;;  %s2398_s30 = sphi %s2503_s30, %s3041_s30   ;;  %s2394_s29 = sphi %s2501_s29, %s3040_s29   ;;  %s2390_s28 = sphi %s2499_s28, %s3046_s28   ;;  %s2386_s27 = sphi %s2497_s27, %s3045_s27  }
   0x9   : > { %3026 = sst [smem:[#allocation7_spill]] %s2394_s29  ;;  %s2055_s18 = sadd.s32 4294967294, %s2414_s17  }
   0xa   : > { %3027 = sst [smem:[#allocation8_spill]] %s2406_s15  ;;  %s43_s19 = sadd.s32 1, %s2406_s15 }
   0xb   : > { %3028 = sst [smem:[#allocation9_spill]] %s2410_s16  ;;  %p45_p0 = scmp.ge.s32.totalorder %s43_s19, 2 }
   0xc   : > { %s47_s20 = sadd.s32 1, %s2410_s16  ;;  %p383_p1 = scmp.ne.s32.totalorder %s2394_s29, %s2390_s28 }
   0xd   : > { %p384_p2 = scmp.eq.s32.totalorder %s2054_s11, 3  ;;  %s3048_s19 = smov (%p45_p0, %s43_s19), 0 }
   0xe   : > { %3029 = sst [smem:[#allocation10_spill]] %s3048_s19  ;;  %s3050_s20 = smov (!%p45_p0, %s47_s20), %s2410_s16 }
   0xf   : > { %s367_s21 = ssub.s32 %s2406_s15, %s3048_s19  ;;  %p2548_p3 = por %p384_p2, %p383_p1 }
  0x10   : > { %p49_p4 = scmp.ge.s32.totalorder %s3050_s20, 2  ;;  %p389_p5 = scmp.ne.s32.totalorder %s2390_s28, %s2386_s27 }
  0x11   : > { %p390_p6 = scmp.eq.s32.totalorder %s2055_s18, 3  ;;  %p2058_p7 = scmp.ge.s32.totalorder %s2414_s17, 1 }
  0x12   : > { %s3052_s20 = smov (%p49_p4, %s3050_s20), 0  ;;  %p493_p9 = scmp.lt.s32.totalorder %s2414_s17, 5 }
  0x13   : > { %3031 = sst [smem:[#allocation11_spill]] %s3052_s20  ;;  %p2557_p8 = por %p390_p6, %p389_p5 }
  0x14   : > { %s366_s24 = ssub.s32 %s2410_s16, %s3052_s20  ;;  %s373_s25 = sadd.s32 1, %s2394_s29 }
  0x15   : > { %s3032_s23 = scalar_select %p2557_p8, 1, 0 }
  0x16   : > { %s368_s26 = sor.u32 %s367_s21, %s366_s24  ;;  %p494_p10 = pnand %p2058_p7, %p493_p9 }
  0x17   : > { %3033 = sst [smem:[#allocation12_spill]] %s3032_s23  ;;  %p371_p11 = scmp.eq.s32.totalorder %s368_s26, 0  ;;  %v2416_v1 = vmov (!%p494_p10), 0   ;;  %v2417_v2 = vmov (!%p494_p10), 0.0   ;;  %vm2418_vm0 = vmmov (!%p494_p10), 0   ;;  %vm648_vm1 = vcmask (!%p494_p10), 261120  }
  0x18   : > { %497 = sbr.rel (%p494_p10) target bundleno = 1154 (0x482), region = 72  ;;  %p577_p12 = scmp.lt.s32.totalorder (!%p494_p10), %s2402_s14, 1  ;;  %2313 = vset.pattern.permute.xlu0 (!%p494_p10), %v2416_v1  ;;  %2163 = vmatprep.subr.bf16.mxu0 (!%p494_p10), %v2417_v2  ;;  %v920_v8 = vld [vmem:[%s3014_s12] sm:$0xff] (!%p494_p10)  ;;  %v921_v9 = vld [vmem:[%s3014_s12 + $0x8] sm:$0x3] (!%p494_p10)  ;;  %vm971_vm2 = vcmask (!%p494_p10), 1041408   ;;  %v782_v23 = vlaneseq (!%p494_p10) }
  0x19   : > { %s2566_s11 = scalar_select %p371_p11, %s2394_s29, %s373_s25  }
  0x1a   : > { %p579_p13 = scmp.lt.s32.totalorder (!%p494_p10), %s2398_s30, 1  ;;  %s3035_s6 = sld [smem:[#allocation14_spill]] (!%p494_p10)  ;;  %2171 = vmatprep.subr.bf16.mxu1 (!%p494_p10), %v2417_v2  ;;  %2167 = vmatprep.mubr.msk.bf16.mxu0 (!%p494_p10), %vm2418_vm0, %v2417_v2  ;;  %v2227_v11 = vpack.c.bf16 (!%p494_p10), %v921_v9, %v920_v8  ;;  %vm2419_vm3 = vmmov (!%p494_p10), 1   ;;  %v2624_v28 = vshrl.u32 (!%p494_p10), %v782_v23, 7  ;;  %v2420_v51 = vmov (!%p494_p10), 1966171168  }
  0x1b   : > { %3034 = sst [smem:[#allocation13_spill]] %s2566_s11  ;;  %2175 = vmatprep.mubr.msk.bf16.mxu1 (!%p494_p10), %vm2418_vm0, %v2417_v2  ;;  %2314 = vset.pattern.permute.xlu1 (!%p494_p10), %v2416_v1  ;;  %vm2228_vm4 = vmpackc.low (!%p494_p10), %vm971_vm2, %vm2419_vm3  ;;  %v1123_v52 = vunpack.c.l.s4 (!%p494_p10), %v2420_v51  ;;  %v2068_v54 = vld [vmem:[%s3009_s7] ss:$0 sm:$0xff] (!%p494_p10)  ;;  %v2715_v51 = vand.u32 (!%p494_p10), 127, %v782_v23  ;;  %vm922_vm14 = vcmask (!%p494_p10), 80896   ;;  %s2122_s16 = sshll.u32 (!%p494_p10), %s2398_s30, 3 }
  0x1c   : > { %v2629_v33 = vsub.s32 (!%p494_p10), 0, %v2624_v28  ;;  %v795_v37 = vsub.s32 (!%p494_p10), 1, %v2624_v28  ;;  %v806_v39 = vsub.s32 (!%p494_p10), 2, %v2624_v28  ;;  %v817_v41 = vsub.s32 (!%p494_p10), 3, %v2624_v28  ;;  %s2124_s29 = sshll.u32 (!%p494_p10), %s2402_s14, 1 }
  0x1d   : > { %v828_v43 = vsub.s32 (!%p494_p10), 4, %v2624_v28  ;;  %v839_v45 = vsub.s32 (!%p494_p10), 5, %v2624_v28  ;;  %v850_v47 = vsub.s32 (!%p494_p10), 6, %v2624_v28  ;;  %v861_v49 = vsub.s32 (!%p494_p10), 7, %v2624_v28 }
  0x1e   : > { %v1124_v53 = vunpack.c.0.s8 (!%p494_p10), %v1123_v52 }
  0x1f   : > { %s2576_s21 = scalar_select %p577_p12, %s2402_s14, 1 }
  0x20   : > { %v2315_v3 = vld [vmem:[%s3035_s6] sm:$0xff]   ;;  %s580_s24 = scalar_select %p579_p13, %s2398_s30, 1  ;;  %v2316_v4 = vld [vmem:[%s3035_s6 + $0x8] sm:$0xff]   ;;  %v1127_v55 = vsub.s32 %v1124_v53, %v2624_v28 }
  0x21   : > { %2164 = vmatpush3.bf16.msra.mxu0 %v2315_v3  ;;  %2172 = vmatpush3.bf16.msra.mxu1 %v2315_v3  ;;  %s2060_s19 = sshll.u32 %s2576_s21, 1  ;;  %s2128_s20 = sshll.u32 %s2576_s21, 3 }
  0x22   : > { %2165 = vmatprep.subr.bf16.mxu0 %v2417_v2  ;;  %2173 = vmatprep.subr.bf16.mxu1 %v2417_v2  ;;  %s2588_s18 = sadd.s32 %s2060_s19, %s580_s24  ;;  %s593_s11 = scalar_lea.vmem %s3003_s1, %s2128_s20 }
  0x23   : > { %s3023_s25 = sshll.u32 %s2588_s18, 3  ;;  %s2061_s26 = sshll.u32 %s2588_s18, 2  ;;  %v2317_v5 = vld [vmem:[%s593_s11] sm:$0xff]  }
  0x24   : > { %s602_s19 = scalar_lea.vmem %s3004_s2, %s3023_s25  ;;  %s584_s27 = scalar_lea.vmem %s3002_s0, %s2061_s26 }
  0x25   : > { %2166 = vmatpush3.bf16.msra.mxu0 %v2316_v4  ;;  %2174 = vmatpush3.bf16.msra.mxu1 %v2316_v4  ;;  %v743_v6 = vld [vmem:[%s602_s19] sm:$0xff]  ;;  %s608_s6 = scalar_lea.vmem %s3005_s3, %s2576_s21  ;;  %s2421_s25 = smov 96  }
  0x26   : > { %v624_v7 = vld [vmem:[%s584_s27] sm:$0xf]  ;;  %746 = vperm.xlu0 %2313, %v743_v6   ;;  %2229 = vmatprep.subr.msk.bf16.mxu0 %vm2228_vm4, %v2227_v11  ;;  %s2422_s26 = smov 64   ;;  %s1890_s20 = sadd.s32 %s2398_s30, %s2124_s29 }
  0x27   : > { %v2074_v10 = vld [vmem:[%s608_s6] ss:$0 sm:$0xff]  ;;  %s2125_s14 = sshll.u32 %s1890_s20, 7  ;;  %s2423_s24 = smov [#allocation3]  }
  0x28   : > { %2168 = vmatmul.mubr.msk.bf16.vlgmr.msra.gmra.mrb[0].mxu0 %vm648_vm1, %v624_v7  ;;  %2176 = vmatmul.mubr.msk.bf16.vlgmr.msra.gmra.mrb[0].mxu1 %vm648_vm1, %v2317_v5 }
  0x29   : > { %2232 = vmatpush3.bf16.msk.msra.mxu0 %vm2228_vm4, %v2227_v11 }
  0xa5   : > { %v747_v12 = vpop.permute.xlu0 %746 }
  0xa6   : > { %v752_v13 = vsub.s32 %v747_v12, %v2074_v10 }
  0xa8   : > { %v754_v14 = vsub.s32 0, %v752_v13 }
  0xaa   : > { %v2075_v15 = vmin.u32 %v754_v14, %v752_v13 }
  0xac   : > { %vm756_vm5 = vcmp.ge.s32.totalorder %v2075_v15, 1  ;;  %vm758_vm6 = vcmp.ge.s32.totalorder %v2075_v15, 3  ;;  %vm761_vm7 = vcmp.ge.s32.totalorder %v2075_v15, 7  ;;  %vm764_vm8 = vcmp.ge.s32.totalorder %v2075_v15, 15 }
  0xad   : > { %v757_v16 = vsel %vm756_vm5, 1, %v2416_v1  ;;  %v759_v17 = vsel %vm758_vm6, 1, %v2416_v1  ;;  %v762_v19 = vsel %vm761_vm7, 1, %v2416_v1  ;;  %vm767_vm9 = vcmp.ge.s32.totalorder %v2075_v15, 31 }
  0xae   : > { %v760_v18 = vadd.s32 %v759_v17, %v757_v16  ;;  %v765_v21 = vsel %vm764_vm8, 1, %v2416_v1  ;;  %vm770_vm10 = vcmp.ge.s32.totalorder %v2075_v15, 63  ;;  %v768_v24 = vsel %vm767_vm9, 1, %v2416_v1 }
  0xaf   : > { %vm773_vm11 = vcmp.ge.s32.totalorder %v2075_v15, 127  ;;  %v771_v26 = vsel %vm770_vm10, 1, %v2416_v1  ;;  %vm776_vm12 = vcmp.ge.s32.totalorder %v2075_v15, 255  ;;  %vm779_vm13 = vcmp.ge.s32.totalorder %v2075_v15, 511 }
  0xb0   : > { %v763_v20 = vadd.s32 %v762_v19, %v760_v18  ;;  %v774_v29 = vsel %vm773_vm11, 1, %v2416_v1  ;;  %v777_v31 = vsel %vm776_vm12, 1, %v2416_v1  ;;  %v780_v34 = vsel %vm779_vm13, 1, %v2416_v1 }
  0xb2   : > { %v766_v22 = vadd.s32 %v765_v21, %v763_v20 }
  0xb4   : > { %v769_v25 = vadd.s32 %v768_v24, %v766_v22 }
  0xb6   : > { %v772_v27 = vadd.s32 %v771_v26, %v769_v25 }
  0xb8   : > { %v775_v30 = vadd.s32 %v774_v29, %v772_v27 }
  0xba   : > { %v778_v32 = vadd.s32 %v777_v31, %v775_v30 }
  0xbc   : > { %v781_v35 = vadd.s32 %v780_v34, %v778_v32 }
  0xbe   : > { %v785_v36 = vrot.slane %v781_v35, %v2629_v33  ;;  %v796_v38 = vrot.slane %v781_v35, %v795_v37  ;;  %v807_v40 = vrot.slane %v781_v35, %v806_v39  ;;  %v818_v42 = vrot.slane %v781_v35, %v817_v41 }
  0xbf   : > { %v829_v44 = vrot.slane %v781_v35, %v828_v43  ;;  %v840_v46 = vrot.slane %v781_v35, %v839_v45  ;;  %v851_v48 = vrot.slane %v781_v35, %v850_v47  ;;  %v862_v50 = vrot.slane %v781_v35, %v861_v49 }
  0xc0   : > { %791 = vbcast.lane.b32.xlu1 %v785_v36, 264  ;;  %787 = vbcast.lane.b32.xlu0 %v785_v36, 256 }
  0xc4   : > { %798 = vbcast.lane.b32.xlu1 %v796_v38, 256  ;;  %802 = vbcast.lane.b32.xlu0 %v796_v38, 264 }
  0xc8   : > { %809 = vbcast.lane.b32.xlu1 %v807_v40, 256  ;;  %813 = vbcast.lane.b32.xlu0 %v807_v40, 264 }
  0xcc   : > { %820 = vbcast.lane.b32.xlu1 %v818_v42, 256  ;;  %824 = vbcast.lane.b32.xlu0 %v818_v42, 264 }
  0xd0   : > { %831 = vbcast.lane.b32.xlu1 %v829_v44, 256  ;;  %835 = vbcast.lane.b32.xlu0 %v829_v44, 264 }
  0xd4   : > { %842 = vbcast.lane.b32.xlu1 %v840_v46, 256  ;;  %846 = vbcast.lane.b32.xlu0 %v840_v46, 264 }
  0xd8   : > { %853 = vbcast.lane.b32.xlu1 %v851_v48, 256  ;;  %857 = vbcast.lane.b32.xlu0 %v851_v48, 264 }
  0xdc   : > { %864 = vbcast.lane.b32.xlu1 %v862_v50, 256  ;;  %868 = vbcast.lane.b32.xlu0 %v862_v50, 264 }
  0xfb   : > { %v686_v56 = vpop.f32.mrb[0].mxu0  ;;  %v736_v57 = vpop.f32.mrb[0].mxu1 }
  0xfc   : > { %v687_v58 = vadd.f32 %v2068_v54, %v686_v56  ;;  %v737_v59 = vadd.f32 %v2068_v54, %v736_v57  ;;  %v2177_v60 = vpop.f32.mrb[1].mxu1  ;;  %v2169_v61 = vpop.f32.mrb[1].mxu0 }
  0xfd   : > { %v739_v62 = vpop.f32.mrb[2].mxu1  ;;  %v689_v63 = vpop.f32.mrb[2].mxu0 }
  0xfe   : > { %v1128_v0 = vrot.slane %v687_v58, %v1127_v55  ;;  %v740_v1 = vadd.f32 %v2068_v54, %v739_v62  ;;  %1212 = vrot.lane.b32.xlu1 %v737_v59, %s2421_s25  ;;  %v2170_v3 = vpop.f32.mrb[3].mxu0  ;;  %v2178_v4 = vpop.f32.mrb[3].mxu1  ;;  %v1121_v7 = vcombine.high %v687_v58, %v687_v58 }
 0x100   : > { %v1136_v5 = vcombine.high %v1128_v0, %v1128_v0  ;;  %v1144_v6 = vrot.slane %v1128_v0, %v1127_v55  ;;  %1214 = vrot.lane.b32.xlu0 %v740_v1, %s2421_s25  ;;  %v1135_v14 = vrot.slane %v1121_v7, %v1127_v55  ;;  %s622_s25 = scalar_lea.vmem %s3007_s5, %s2576_s21 }
 0x102   : > { %v1158_v8 = vrot.slane %v1136_v5, %v1127_v55  ;;  %v1166_v9 = vcombine.high %v1144_v6, %v1144_v6  ;;  %v2659_v10 = vrot.slane %v1144_v6, %v2629_v33  ;;  %v1137_v19 = vcombine.high %v1135_v14, %v1135_v14 }
 0x103   : > { %v1151_v20 = vrot.slane %v1135_v14, %v1127_v55 }
 0x104   : > { %v2662_v11 = vrot.slane %v1158_v8, %v2629_v33  ;;  %v1235_v12 = vmul.f32 %v2659_v10, %v740_v1  ;;  %v1234_v13 = vmul.f32 %v2659_v10, %v737_v59  ;;  %v1168_v15 = vcombine.high %v1158_v8, %v1158_v8 }
 0x105   : > { %v2667_v16 = vrot.slane %v1166_v9, %v2629_v33  ;;  %v1165_v25 = vrot.slane %v1137_v19, %v1127_v55  ;;  %v2681_v26 = vrot.slane %v1151_v20, %v2629_v33  ;;  %v1167_v30 = vcombine.high %v1151_v20, %v1151_v20 }
 0x106   : > { %1268 = vrot.lane.b32.xlu0 %v1235_v12, %s2422_s26  ;;  %1266 = vrot.lane.b32.xlu1 %v1234_v13, %s2422_s26  ;;  %v1237_v17 = vmul.f32 %v2662_v11, %v740_v1  ;;  %v1236_v18 = vmul.f32 %v2662_v11, %v737_v59  ;;  %v2674_v21 = vrot.slane %v1168_v15, %v2629_v33 }
 0x107   : > { %v1239_v22 = vmul.f32 %v2667_v16, %v740_v1  ;;  %v1238_v24 = vmul.f32 %v2667_v16, %v737_v59  ;;  %v2688_v31 = vrot.slane %v1165_v25, %v2629_v33  ;;  %v1243_v32 = vmul.f32 %v2681_v26, %v740_v1 }
 0x108   : > { %v1241_v27 = vmul.f32 %v2674_v21, %v740_v1  ;;  %v1240_v29 = vmul.f32 %v2674_v21, %v737_v59  ;;  %v1242_v34 = vmul.f32 %v2681_v26, %v737_v59  ;;  %v1169_v35 = vcombine.high %v1165_v25, %v1165_v25  ;;  %v2318_v25 = vld [vmem:[%s3010_s8] sm:$0xff]  }
 0x109   : > { %v2695_v36 = vrot.slane %v1167_v30, %v2629_v33  ;;  %v1245_v38 = vmul.f32 %v2688_v31, %v740_v1  ;;  %v1244_v40 = vmul.f32 %v2688_v31, %v737_v59  ;;  %2207 = vmatprep.subr.bf16.mxu1 %v2318_v25 }
 0x10a   : > { %1272 = vrot.lane.b32.xlu0 %v1237_v17, %s2422_s26  ;;  %1270 = vrot.lane.b32.xlu1 %v1236_v18, %s2422_s26  ;;  %v2706_v46 = vrot.slane %v1169_v35, %v2629_v33 }
 0x10b   : > { %v1247_v42 = vmul.f32 %v2695_v36, %v740_v1  ;;  %v1246_v44 = vmul.f32 %v2695_v36, %v737_v59  ;;  %2208 = vmatpush3.bf16.msra.mxu1 %v2318_v25 }
 0x10c   : > { %v1249_v48 = vmul.f32 %v2706_v46, %v740_v1  ;;  %v1248_v50 = vmul.f32 %v2706_v46, %v737_v59 }
 0x10e   : > { %1276 = vrot.lane.b32.xlu0 %v1239_v22, %s2422_s26  ;;  %1274 = vrot.lane.b32.xlu1 %v1238_v24, %s2422_s26 }
 0x112   : > { %1280 = vrot.lane.b32.xlu0 %v1241_v27, %s2422_s26  ;;  %1278 = vrot.lane.b32.xlu1 %v1240_v29, %s2422_s26  ;;  %v2319_v27 = vld [vmem:[%s3010_s8 + $0x8] sm:$0xff]  }
 0x113   : > { %2209 = vmatprep.subr.bf16.mxu1 %v2319_v27 }
 0x114   : > { %2210 = vmatpush3.bf16.msra.mxu1 %v2319_v27 }
 0x116   : > { %1284 = vrot.lane.b32.xlu0 %v1243_v32, %s2422_s26  ;;  %1282 = vrot.lane.b32.xlu1 %v1242_v34, %s2422_s26 }
 0x11a   : > { %1288 = vrot.lane.b32.xlu0 %v1245_v38, %s2422_s26  ;;  %1286 = vrot.lane.b32.xlu1 %v1244_v40, %s2422_s26 }
 0x11e   : > { %1292 = vrot.lane.b32.xlu0 %v1247_v42, %s2422_s26  ;;  %1290 = vrot.lane.b32.xlu1 %v1246_v44, %s2422_s26 }
 0x122   : > { %1296 = vrot.lane.b32.xlu0 %v1249_v48, %s2422_s26  ;;  %1294 = vrot.lane.b32.xlu1 %v1248_v50, %s2422_s26  ;;  %s3036_s26 = sshll.u32 %s2588_s18, 3  ;;  %s574_s18 = sand.u32 1, %s2390_s28  }
 0x123   : > { %s616_s15 = scalar_lea.vmem %s3006_s4, %s3036_s26  ;;  %s2932_s6 = sshll.u32 %s574_s18, 3 }
 0x124   : > { %s576_s23 = scalar_lea.vmem [#allocation3], %s2932_s6  ;;  %s1878_s26 = scalar_lea.sflag [#allocation4], %s574_s18 }
 0x125   : > { %s1894_s27 = sshll.u32 %s576_s23, 4  ;;  %s2949_s27 = int_to_ptr.vmem [resolvable:$true] %s1894_s27 }
 0x126   : > { %s2320_s19 = scalar_lea.vmem %s2949_s27, 128 }
 0x127   : > { %p2321_p0 = scmp.ne.s32.totalorder %s2949_s27, %s2320_s19 }
 0x129   : > { %p2322_p1 = pnand %p2321_p0, %p2548_p3 }
 0x12b   : > { %p2323_p2 = pneg %p2322_p1 }
 0x132   : > { %v792_v52 = vpop.permute.xlu1 %791  ;;  %v788_v53 = vpop.permute.xlu0 %787 }
 0x133   : > { %vm873_vm15 = vcmp.eq.s32.totalorder %v792_v52, %v2715_v51  ;;  %vm872_vm0 = vcmp.eq.s32.totalorder %v788_v53, %v2715_v51 }
 0x134   : > { %v2077_v54 = vsel %vm873_vm15, 1.0, %v2417_v2  ;;  %v2076_v55 = vsel %vm872_vm0, 1.0, %v2417_v2 }
 0x135   : > { %2183 = vmatprep.mubr.msk.f32.mxu0 %vm922_vm14, %v2076_v55 }
 0x136   : > { %v799_v56 = vpop.permute.xlu1 %798  ;;  %v803_v57 = vpop.permute.xlu0 %802  ;;  %2184 = vmatmul.mubr.msk.f32.vlgmr.msra.gmra.mrb[4].mxu0 %vm922_vm14, %v2077_v54 }
 0x137   : > { %vm874_vm2 = vcmp.eq.s32.totalorder %v799_v56, %v2715_v51  ;;  %vm875_vm3 = vcmp.eq.s32.totalorder %v803_v57, %v2715_v51 }
 0x138   : > { %v2078_v23 = vsel %vm874_vm2, 1.0, %v2417_v2  ;;  %v2079_v58 = vsel %vm875_vm3, 1.0, %v2417_v2  ;;  %vm1861_vm2 = vcmask 1042434   ;;  %vm1863_vm3 = vcmask 1043459  }
 0x139   : > { %2186 = vmatprep.mubr.msk.f32.mxu0 %vm922_vm14, %v2078_v23 }
 0x13a   : > { %v810_v59 = vpop.permute.xlu1 %809  ;;  %v814_v60 = vpop.permute.xlu0 %813  ;;  %2187 = vmatmul.mubr.msk.f32.gmra.mrb[6].mxu0 %vm922_vm14, %v2079_v58 }
 0x13b   : > { %vm876_vm4 = vcmp.eq.s32.totalorder %v810_v59, %v2715_v51  ;;  %vm877_vm5 = vcmp.eq.s32.totalorder %v814_v60, %v2715_v51 }
 0x13c   : > { %v2080_v61 = vsel %vm876_vm4, 1.0, %v2417_v2  ;;  %v2081_v62 = vsel %vm877_vm5, 1.0, %v2417_v2  ;;  %vm1865_vm4 = vcmask 1044484   ;;  %vm1867_vm5 = vcmask 1045509  }
 0x13d   : > { %2189 = vmatprep.mubr.msk.f32.mxu0 %vm922_vm14, %v2080_v61 }
 0x13e   : > { %v821_v63 = vpop.permute.xlu1 %820  ;;  %v825_v0 = vpop.permute.xlu0 %824  ;;  %2190 = vmatmul.mubr.msk.f32.gmra.mrb[8].mxu0 %vm922_vm14, %v2081_v62 }
 0x13f   : > { %vm878_vm6 = vcmp.eq.s32.totalorder %v821_v63, %v2715_v51  ;;  %vm879_vm7 = vcmp.eq.s32.totalorder %v825_v0, %v2715_v51 }
 0x140   : > { %v2082_v1 = vsel %vm878_vm6, 1.0, %v2417_v2  ;;  %v2083_v3 = vsel %vm879_vm7, 1.0, %v2417_v2  ;;  %vm1869_vm6 = vcmask 1046534   ;;  %vm1871_vm7 = vcmask 1047559  }
 0x141   : > { %2192 = vmatprep.mubr.msk.f32.mxu0 %vm922_vm14, %v2082_v1 }
 0x142   : > { %v832_v4 = vpop.permute.xlu1 %831  ;;  %v836_v5 = vpop.permute.xlu0 %835  ;;  %2193 = vmatmul.mubr.msk.f32.gmra.mrb[10].mxu0 %vm922_vm14, %v2083_v3 }
 0x143   : > { %vm880_vm8 = vcmp.eq.s32.totalorder %v832_v4, %v2715_v51  ;;  %vm881_vm9 = vcmp.eq.s32.totalorder %v836_v5, %v2715_v51 }
 0x144   : > { %v2084_v6 = vsel %vm880_vm8, 1.0, %v2417_v2  ;;  %v2085_v7 = vsel %vm881_vm9, 1.0, %v2417_v2  ;;  %vm1875_vm9 = vcmask 130048  }
 0x145   : > { %2195 = vmatprep.mubr.msk.f32.mxu0 %vm922_vm14, %v2084_v6 }
 0x146   : > { %v843_v8 = vpop.permute.xlu1 %842  ;;  %v847_v9 = vpop.permute.xlu0 %846  ;;  %2196 = vmatmul.mubr.msk.f32.gmra.mrb[12].mxu0 %vm922_vm14, %v2085_v7 }
 0x147   : > { %vm882_vm10 = vcmp.eq.s32.totalorder %v843_v8, %v2715_v51  ;;  %vm883_vm11 = vcmp.eq.s32.totalorder %v847_v9, %v2715_v51 }
 0x148   : > { %v2086_v12 = vsel %vm882_vm10, 1.0, %v2417_v2  ;;  %v2087_v13 = vsel %vm883_vm11, 1.0, %v2417_v2 }
 0x149   : > { %2198 = vmatprep.mubr.msk.f32.mxu0 %vm922_vm14, %v2086_v12 }
 0x14a   : > { %v854_v14 = vpop.permute.xlu1 %853  ;;  %v858_v15 = vpop.permute.xlu0 %857  ;;  %2199 = vmatmul.mubr.msk.f32.gmra.mrb[14].mxu0 %vm922_vm14, %v2087_v13 }
 0x14b   : > { %vm884_vm12 = vcmp.eq.s32.totalorder %v854_v14, %v2715_v51  ;;  %vm885_vm13 = vcmp.eq.s32.totalorder %v858_v15, %v2715_v51 }
 0x14c   : > { %v2088_v17 = vsel %vm884_vm12, 1.0, %v2417_v2  ;;  %v2089_v18 = vsel %vm885_vm13, 1.0, %v2417_v2 }
 0x14d   : > { %2201 = vmatprep.mubr.msk.f32.mxu0 %vm922_vm14, %v2088_v17 }
 0x14e   : > { %v865_v19 = vpop.permute.xlu1 %864  ;;  %v869_v20 = vpop.permute.xlu0 %868  ;;  %2202 = vmatmul.mubr.msk.f32.gmra.mrb[16].mxu0 %vm922_vm14, %v2089_v18 }
 0x14f   : > { %vm886_vm15 = vcmp.eq.s32.totalorder %v865_v19, %v2715_v51  ;;  %vm887_vm0 = vcmp.eq.s32.totalorder %v869_v20, %v2715_v51 }
 0x150   : > { %v2090_v22 = vsel %vm886_vm15, 1.0, %v2417_v2  ;;  %v2091_v24 = vsel %vm887_vm0, 1.0, %v2417_v2 }
 0x151   : > { %2204 = vmatprep.mubr.msk.f32.mxu0 %vm922_vm14, %v2090_v22 }
 0x152   : > { %2205 = vmatmul.mubr.msk.f32.gmra.mrb[18].mxu0 %vm922_vm14, %v2091_v24  ;;  %vm1859_vm14 = vcmask 1041409  }
 0x170   : > { %v2773_v30 = vpop.permute.xlu1 %1212 }
 0x171   : > { %v1218_v44 = vadd.f32 %v2773_v30, %v2659_v10  ;;  %v1220_v53 = vadd.f32 %v2773_v30, %v2662_v11  ;;  %v1222_v62 = vadd.f32 %v2773_v30, %v2667_v16  ;;  %v1224_v13 = vadd.f32 %v2773_v30, %v2674_v21 }
 0x172   : > { %v2771_v29 = vpop.permute.xlu0 %1214  ;;  %v1226_v27 = vadd.f32 %v2773_v30, %v2681_v26 }
 0x173   : > { %v1219_v40 = vadd.f32 %v2771_v29, %v2659_v10  ;;  %v1221_v50 = vadd.f32 %v2771_v29, %v2662_v11  ;;  %v1223_v60 = vadd.f32 %v2771_v29, %v2667_v16  ;;  %v1225_v7 = vadd.f32 %v2771_v29, %v2674_v21 }
 0x174   : > { %v1227_v22 = vadd.f32 %v2771_v29, %v2681_v26 }
 0x178   : > { %v1269_v2 = vpop.permute.xlu0 %1268  ;;  %v1267_v32 = vpop.permute.xlu1 %1266 }
 0x179   : > { %v1315_v48 = vadd.f32 %v1269_v2, %v1219_v40  ;;  %v1314_v52 = vadd.f32 %v1267_v32, %v1218_v44 }
 0x17c   : > { %v1273_v34 = vpop.permute.xlu0 %1272  ;;  %v1271_v35 = vpop.permute.xlu1 %1270 }
 0x17d   : > { %v1317_v59 = vadd.f32 %v1273_v34, %v1221_v50  ;;  %v1316_v10 = vadd.f32 %v1271_v35, %v1220_v53  ;;  %v1228_v53 = vadd.f32 %v2773_v30, %v2688_v31 }
 0x180   : > { %v1277_v38 = vpop.permute.xlu0 %1276  ;;  %v1275_v42 = vpop.permute.xlu1 %1274 }
 0x181   : > { %v1319_v6 = vadd.f32 %v1277_v38, %v1223_v60  ;;  %v1318_v12 = vadd.f32 %v1275_v42, %v1222_v62  ;;  %v1231_v60 = vadd.f32 %v2771_v29, %v2695_v36 }
 0x184   : > { %v1281_v54 = vpop.permute.xlu0 %1280  ;;  %v1279_v56 = vpop.permute.xlu1 %1278 }
 0x185   : > { %v1321_v20 = vadd.f32 %v1281_v54, %v1225_v7  ;;  %v1320_v25 = vadd.f32 %v1279_v56, %v1224_v13 }
 0x188   : > { %v1285_v11 = vpop.permute.xlu0 %1284  ;;  %v1283_v8 = vpop.permute.xlu1 %1282 }
 0x189   : > { %v1323_v44 = vadd.f32 %v1285_v11, %v1227_v22 }
 0x18c   : > { %v1289_v2 = vpop.permute.xlu0 %1288  ;;  %v1287_v34 = vpop.permute.xlu1 %1286 }
 0x18d   : > { %v1324_v62 = vadd.f32 %v1287_v34, %v1228_v53  ;;  %v1601_v34 = vld [vmem:[#allocation2] sm:$0x1] }
 0x18e   : > { %2233 = vpush %v1601_v34 }
 0x1bf   : > { %s2234_s21 = spop %2233 }
 0x209   : > { %v2185_v55 = vpop.f32.mrb[4].mxu0 }
 0x20a   : > { %v1331_v57 = vadd.f32 %v2185_v55, %v1315_v48  ;;  %v1041_v23 = vpop.f32.mrb[5].mxu0  ;;  %v1229_v48 = vadd.f32 %v2771_v29, %v2688_v31 }
 0x20b   : > { %v1330_v58 = vadd.f32 %v1314_v52, %v1041_v23  ;;  %v1322_v52 = vadd.f32 %v1283_v8, %v1226_v27 }
 0x20c   : > { %v1347_v61 = vmax.f32 %v1331_v57, 0.0  ;;  %v1293_v57 = vpop.permute.xlu0 %1292 }
 0x20d   : > { %v1346_v63 = vmax.f32 %v1330_v58, 0.0  ;;  %v2188_v0 = vpop.f32.mrb[6].mxu0 }
 0x20e   : > { %v1333_v1 = vadd.f32 %v2188_v0, %v1317_v59  ;;  %v1051_v3 = vpop.f32.mrb[7].mxu0  ;;  %v1325_v59 = vadd.f32 %v1289_v2, %v1229_v48 }
 0x20f   : > { %v1362_v4 = vpack.c.bf16 %v1347_v61, %v1346_v63  ;;  %v1332_v5 = vadd.f32 %v1316_v10, %v1051_v3  ;;  %v1291_v61 = vpop.permute.xlu1 %1290  ;;  %v1230_v63 = vadd.f32 %v2773_v30, %v2695_v36 }
 0x210   : > { %v1349_v9 = vmax.f32 %v1333_v1, 0.0 }
 0x211   : > { %v1348_v14 = vmax.f32 %v1332_v5, 0.0  ;;  %v2191_v15 = vpop.f32.mrb[8].mxu0  ;;  %2211 = vmatprep.mubr.msk.bf16.mxu1 %vm648_vm1, %v1362_v4  ;;  %v1327_v5 = vadd.f32 %v1293_v57, %v1231_v60  ;;  %v1326_v8 = vadd.f32 %v1291_v61, %v1230_v63 }
 0x212   : > { %v1335_v16 = vadd.f32 %v2191_v15, %v1319_v6  ;;  %v1061_v17 = vpop.f32.mrb[9].mxu0  ;;  %v1233_v6 = vadd.f32 %v2771_v29, %v2706_v46 }
 0x213   : > { %v1363_v18 = vpack.c.bf16 %v1349_v9, %v1348_v14  ;;  %v1334_v19 = vadd.f32 %v1318_v12, %v1061_v17  ;;  %v1297_v9 = vpop.permute.xlu0 %1296  ;;  %v1232_v12 = vadd.f32 %v2773_v30, %v2706_v46  ;;  %v1295_v14 = vpop.permute.xlu1 %1294 }
 0x214   : > { %v1351_v24 = vmax.f32 %v1335_v16, 0.0 }
 0x215   : > { %v1350_v32 = vmax.f32 %v1334_v19, 0.0  ;;  %v2194_v21 = vpop.f32.mrb[10].mxu0  ;;  %2212 = vmatmul.mubr.msk.bf16.vlgmr.msra.gmra.mrb[4].mxu1 %vm648_vm1, %v1363_v18  ;;  %v1329_v19 = vadd.f32 %v1297_v9, %v1233_v6  ;;  %v1328_v22 = vadd.f32 %v1295_v14, %v1232_v12 }
 0x216   : > { %v1337_v35 = vadd.f32 %v2194_v21, %v1321_v20  ;;  %v1071_v38 = vpop.f32.mrb[11].mxu0 }
 0x217   : > { %v1364_v40 = vpack.c.bf16 %v1351_v24, %v1350_v32  ;;  %v1336_v42 = vadd.f32 %v1320_v25, %v1071_v38 }
 0x218   : > { %v1353_v50 = vmax.f32 %v1337_v35, 0.0  ;;  %v2818_v35 = vld [vmem:[%s3011_s9] ss:$0 sm:$0xff] }
 0x219   : > { %v1352_v26 = vmax.f32 %v1336_v42, 0.0  ;;  %v2197_v54 = vpop.f32.mrb[12].mxu0  ;;  %2215 = vmatprep.mubr.msk.bf16.mxu1 %vm648_vm1, %v1364_v40 }
 0x21a   : > { %v1339_v55 = vadd.f32 %v2197_v54, %v1323_v44  ;;  %v1081_v56 = vpop.f32.mrb[13].mxu0 }
 0x21b   : > { %v1365_v23 = vpack.c.bf16 %v1353_v50, %v1352_v26  ;;  %v1338_v58 = vadd.f32 %v1322_v52, %v1081_v56  ;;  %v2825_v50 = vld [vmem:[%s3012_s10] ss:$0 sm:$0xff] }
 0x21c   : > { %v1355_v10 = vmax.f32 %v1339_v55, 0.0 }
 0x21d   : > { %v1354_v31 = vmax.f32 %v1338_v58, 0.0  ;;  %v2200_v0 = vpop.f32.mrb[14].mxu0  ;;  %2216 = vmatmul.mubr.msk.bf16.gmra.mrb[8].mxu1 %vm648_vm1, %v1365_v23 }
 0x21e   : > { %v1341_v1 = vadd.f32 %v2200_v0, %v1325_v59  ;;  %v1091_v3 = vpop.f32.mrb[15].mxu0 }
 0x21f   : > { %v1366_v11 = vpack.c.bf16 %v1355_v10, %v1354_v31  ;;  %v1340_v4 = vadd.f32 %v1324_v62, %v1091_v3 }
 0x220   : > { %v1357_v7 = vmax.f32 %v1341_v1, 0.0 }
 0x221   : > { %v1356_v13 = vmax.f32 %v1340_v4, 0.0  ;;  %v2203_v36 = vpop.f32.mrb[16].mxu0  ;;  %2219 = vmatprep.mubr.msk.bf16.mxu1 %vm648_vm1, %v1366_v11 }
 0x222   : > { %v1343_v15 = vadd.f32 %v2203_v36, %v1327_v5  ;;  %v1101_v16 = vpop.f32.mrb[17].mxu0 }
 0x223   : > { %v1367_v17 = vpack.c.bf16 %v1357_v7, %v1356_v13  ;;  %v1342_v18 = vadd.f32 %v1326_v8, %v1101_v16 }
 0x224   : > { %v1359_v20 = vmax.f32 %v1343_v15, 0.0 }
 0x225   : > { %v1358_v24 = vmax.f32 %v1342_v18, 0.0  ;;  %v2206_v29 = vpop.f32.mrb[18].mxu0  ;;  %2220 = vmatmul.mubr.msk.bf16.gmra.mrb[12].mxu1 %vm648_vm1, %v1367_v17 }
 0x226   : > { %v1345_v25 = vadd.f32 %v2206_v29, %v1329_v19  ;;  %v1111_v27 = vpop.f32.mrb[19].mxu0 }
 0x227   : > { %v1368_v2 = vpack.c.bf16 %v1359_v20, %v1358_v24  ;;  %v1344_v46 = vadd.f32 %v1328_v22, %v1111_v27 }
 0x228   : > { %v1361_v30 = vmax.f32 %v1345_v25, 0.0 }
 0x229   : > { %v1360_v32 = vmax.f32 %v1344_v46, 0.0  ;;  %2223 = vmatprep.mubr.msk.bf16.mxu1 %vm648_vm1, %v1368_v2 }
 0x22b   : > { %v1369_v21 = vpack.c.bf16 %v1361_v30, %v1360_v32 }
 0x22d   : > { %2224 = vmatmul.mubr.msk.bf16.gmra.mrb[16].mxu1 %vm648_vm1, %v1369_v21 }
 0x2e8   : > { %v2213_v38 = vpop.f32.mrb[4].mxu1 }
 0x2e9   : > { %v1460_v40 = vadd.f32 %v2213_v38, %v2818_v35  ;;  %v1451_v42 = vpop.f32.mrb[5].mxu1 }
 0x2ea   : > { %v1452_v44 = vadd.f32 %v2818_v35, %v1451_v42  ;;  %v2214_v48 = vpop.f32.mrb[6].mxu1 }
 0x2eb   : > { %v1516_v52 = vmax.f32 %v1460_v40, 0.0  ;;  %v1463_v53 = vadd.f32 %v2214_v48, %v2818_v35  ;;  %v1454_v26 = vpop.f32.mrb[7].mxu1 }
 0x2ec   : > { %v1514_v54 = vmax.f32 %v1452_v44, 0.0  ;;  %v1455_v55 = vadd.f32 %v2818_v35, %v1454_v26 }
 0x2ed   : > { %v1517_v56 = vmax.f32 %v1463_v53, 0.0  ;;  %v1539_v57 = vmul.f32 %v2825_v50, %v1516_v52 }
 0x2ee   : > { %v1515_v23 = vmax.f32 %v1455_v55, 0.0  ;;  %v1537_v58 = vmul.f32 %v2825_v50, %v1514_v54 }
 0x2ef   : > { %v1559_v59 = vsel %vm648_vm1, %v1539_v57, 0.0  ;;  %v1540_v62 = vmul.f32 %v2825_v50, %v1517_v56 }
 0x2f0   : > { %1560 = vadd.xlane.f32.xlu0 %v1559_v59  ;;  %v2217_v60 = vpop.f32.mrb[8].mxu1  ;;  %v1553_v61 = vsel %vm648_vm1, %v1537_v58, 0.0  ;;  %v1538_v10 = vmul.f32 %v2825_v50, %v1515_v23 }
 0x2f1   : > { %v1476_v63 = vadd.f32 %v2217_v60, %v2818_v35  ;;  %1554 = vadd.xlane.f32.xlu1 %v1553_v61  ;;  %v1467_v31 = vpop.f32.mrb[9].mxu1  ;;  %v1562_v8 = vsel %vm648_vm1, %v1540_v62, 0.0 }
 0x2f2   : > { %v1468_v0 = vadd.f32 %v2818_v35, %v1467_v31  ;;  %v2218_v1 = vpop.f32.mrb[10].mxu1  ;;  %v1556_v3 = vsel %vm648_vm1, %v1538_v10, 0.0 }
 0x2f3   : > { %v1520_v11 = vmax.f32 %v1476_v63, 0.0  ;;  %v1479_v4 = vadd.f32 %v2218_v1, %v2818_v35  ;;  %v1470_v5 = vpop.f32.mrb[11].mxu1 }
 0x2f4   : > { %v1518_v6 = vmax.f32 %v1468_v0, 0.0  ;;  %v1471_v7 = vadd.f32 %v2818_v35, %v1470_v5  ;;  %1557 = vadd.xlane.f32.xlu0 %v1556_v3  ;;  %v1620_v5 = vld [vmem:[%s616_s15] sm:$0xff]  ;;  %s2324_s15 = sshll.u32 %s2423_s24, 4  ;;  %s2325_s15 = int_to_ptr.vmem [resolvable:$false] %s2324_s15 }
 0x2f5   : > { %v1521_v9 = vmax.f32 %v1479_v4, 0.0  ;;  %1563 = vadd.xlane.f32.xlu1 %v1562_v8  ;;  %v1543_v12 = vmul.f32 %v2825_v50, %v1520_v11  ;;  %v2121_v4 = vld [vmem:[%s622_s25] ss:$0 sm:$0xff]  ;;  %s2947_s25 = scalar_lea.hbm %s3015_s13, %s2125_s14  ;;  %p2327_p4 = scmp.lt.s32.totalorder %s2949_s27, %s2325_s15 }
 0x2f6   : > { %v1519_v13 = vmax.f32 %v1471_v7, 0.0  ;;  %v1541_v15 = vmul.f32 %v2825_v50, %v1518_v6 }
 0x2f7   : > { %v1571_v36 = vsel %vm648_vm1, %v1543_v12, 0.0  ;;  %v1544_v14 = vmul.f32 %v2825_v50, %v1521_v9 }
 0x2f8   : > { %1572 = vadd.xlane.f32.xlu0 %v1571_v36  ;;  %v2221_v16 = vpop.f32.mrb[12].mxu1  ;;  %v1542_v20 = vmul.f32 %v2825_v50, %v1519_v13  ;;  %v1565_v2 = vsel %vm648_vm1, %v1541_v15, 0.0 }
 0x2f9   : > { %v1492_v17 = vadd.f32 %v2221_v16, %v2818_v35  ;;  %v1483_v18 = vpop.f32.mrb[13].mxu1  ;;  %v1574_v19 = vsel %vm648_vm1, %v1544_v14, 0.0 }
 0x2fa   : > { %v1484_v22 = vadd.f32 %v2818_v35, %v1483_v18  ;;  %1575 = vadd.xlane.f32.xlu1 %v1574_v19  ;;  %v2222_v24 = vpop.f32.mrb[14].mxu1  ;;  %v1568_v21 = vsel %vm648_vm1, %v1542_v20, 0.0 }
 0x2fb   : > { %v1524_v29 = vmax.f32 %v1492_v17, 0.0  ;;  %v1495_v25 = vadd.f32 %v2222_v24, %v2818_v35  ;;  %v1486_v27 = vpop.f32.mrb[15].mxu1 }
 0x2fc   : > { %v1522_v46 = vmax.f32 %v1484_v22, 0.0  ;;  %v1487_v30 = vadd.f32 %v2818_v35, %v1486_v27  ;;  %1566 = vadd.xlane.f32.xlu0 %v1565_v2  ;;  %v2884_v22 = vstv %s2234_s21  ;;  %s2326_s21 = scalar_lea.vmem %s2325_s15, 256 }
 0x2fd   : > { %v1525_v32 = vmax.f32 %v1495_v25, 0.0  ;;  %v1547_v34 = vmul.f32 %v2825_v50, %v1524_v29  ;;  %p2328_p5 = scmp.lt.s32.totalorder %s2326_s21, %s2320_s19 }
 0x2fe   : > { %v1523_v38 = vmax.f32 %v1487_v30, 0.0  ;;  %1569 = vadd.xlane.f32.xlu1 %v1568_v21  ;;  %v1545_v44 = vmul.f32 %v2825_v50, %v1522_v46 }
 0x2ff   : > { %v1583_v40 = vsel %vm648_vm1, %v1547_v34, 0.0  ;;  %v1548_v42 = vmul.f32 %v2825_v50, %v1525_v32  ;;  %p2329_p6 = por %p2328_p5, %p2327_p4 }
 0x300   : > { %1584 = vadd.xlane.f32.xlu0 %v1583_v40  ;;  %v2225_v48 = vpop.f32.mrb[16].mxu1  ;;  %v1546_v54 = vmul.f32 %v2825_v50, %v1523_v38  ;;  %v1577_v59 = vsel %vm648_vm1, %v1545_v44, 0.0 }
 0x301   : > { %v1508_v52 = vadd.f32 %v2225_v48, %v2818_v35  ;;  %v1499_v53 = vpop.f32.mrb[17].mxu1  ;;  %v1586_v26 = vsel %vm648_vm1, %v1548_v42, 0.0  ;;  %p2330_p7 = pnand %p2329_p6, %p2323_p2 }
 0x302   : > { %v1500_v55 = vadd.f32 %v2818_v35, %v1499_v53  ;;  %1587 = vadd.xlane.f32.xlu1 %v1586_v26  ;;  %v2226_v56 = vpop.f32.mrb[18].mxu1  ;;  %v1580_v62 = vsel %vm648_vm1, %v1546_v54, 0.0 }
 0x303   : > { %v1528_v57 = vmax.f32 %v1508_v52, 0.0  ;;  %v1511_v23 = vadd.f32 %v2226_v56, %v2818_v35  ;;  %v1502_v58 = vpop.f32.mrb[19].mxu1 }
 0x304   : > { %v1526_v60 = vmax.f32 %v1500_v55, 0.0  ;;  %v1503_v61 = vadd.f32 %v2818_v35, %v1502_v58  ;;  %1578 = vadd.xlane.f32.xlu0 %v1577_v59 }
 0x305   : > { %v1529_v10 = vmax.f32 %v1511_v23, 0.0  ;;  %v1551_v63 = vmul.f32 %v2825_v50, %v1528_v57 }
 0x306   : > { %v1527_v31 = vmax.f32 %v1503_v61, 0.0  ;;  %1581 = vadd.xlane.f32.xlu1 %v1580_v62  ;;  %v1549_v1 = vmul.f32 %v2825_v50, %v1526_v60 }
 0x307   : > { %v1595_v0 = vsel %vm648_vm1, %v1551_v63, 0.0  ;;  %v1552_v3 = vmul.f32 %v2825_v50, %v1529_v10 }
 0x308   : > { %1596 = vadd.xlane.f32.xlu0 %v1595_v0  ;;  %v1550_v11 = vmul.f32 %v2825_v50, %v1527_v31  ;;  %v1589_v35 = vsel %vm648_vm1, %v1549_v1, 0.0 }
 0x309   : > { %v1598_v6 = vsel %vm648_vm1, %v1552_v3, 0.0 }
 0x30a   : > { %v1592_v50 = vsel %vm648_vm1, %v1550_v11, 0.0  ;;  %vm1794_vm1 = vcmask 130112  }
 0x30c   : > { %1590 = vadd.xlane.f32.xlu0 %v1589_v35 }
 0x317   : > { %1688 = vbcast.lane.b32.xlu1 %v2121_v4, 256 }
 0x322   : > { %1623 = vperm.xlu0 %2313, %v1620_v5  }
 0x33b   : > { %1599 = vadd.xlane.f32.xlu1 %v1598_v6 }
 0x33f   : > { %1593 = vadd.xlane.f32.xlu1 %v1592_v50 }
 0x350   : > { %1692 = vbcast.lane.b32.xlu1 %v2121_v4, 264 }
 0x37d   : > { %v1561_v7 = vpop.xlane.xlu0 %1560 }
 0x37e   : > { %v1555_v8 = vpop.xlane.xlu1 %1554  ;;  %v1606_v25 = vadd.f32 %v2884_v22, %v1561_v7 }
 0x37f   : > { %v1604_v46 = vadd.f32 %v2884_v22, %v1555_v8 }
 0x381   : > { %v1558_v9 = vpop.xlane.xlu0 %1557 }
 0x382   : > { %v1564_v13 = vpop.xlane.xlu1 %1563  ;;  %v1605_v3 = vadd.f32 %v2884_v22, %v1558_v9 }
 0x385   : > { %v1573_v12 = vpop.xlane.xlu0 %1572 }
 0x386   : > { %v1610_v40 = vadd.f32 %v2884_v22, %v1573_v12 }
 0x387   : > { %v1576_v14 = vpop.xlane.xlu1 %1575 }
 0x389   : > { %v1567_v36 = vpop.xlane.xlu0 %1566 }
 0x38b   : > { %v1570_v17 = vpop.xlane.xlu1 %1569 }
 0x38c   : > { %v1609_v6 = vadd.f32 %v2884_v22, %v1570_v17 }
 0x38d   : > { %v1585_v15 = vpop.xlane.xlu0 %1584 }
 0x38e   : > { %v1614_v26 = vadd.f32 %v2884_v22, %v1585_v15 }
 0x38f   : > { %v2882_v19 = vpop.xlane.xlu1 %1587 }
 0x390   : > { %v1615_v8 = vadd.f32 %v2884_v22, %v2882_v19 }
 0x391   : > { %v1579_v16 = vpop.xlane.xlu0 %1578 }
 0x392   : > { %v1612_v56 = vadd.f32 %v2884_v22, %v1579_v16 }
 0x393   : > { %v2886_v24 = vpop.xlane.xlu1 %1581 }
 0x394   : > { %v1613_v9 = vadd.f32 %v2884_v22, %v2886_v24 }
 0x395   : > { %v1597_v18 = vpop.xlane.xlu0 %1596 }
 0x396   : > { %v1618_v61 = vadd.f32 %v2884_v22, %v1597_v18 }
 0x397   : > { %v1689_v32 = vpop.permute.xlu1 %1688 }
 0x399   : > { %v1591_v20 = vpop.xlane.xlu0 %1590 }
 0x39a   : > { %v1616_v58 = vadd.f32 %v2884_v22, %v1591_v20 }
 0x3a1   : > { %v1624_v29 = vpop.permute.xlu0 %1623 }
 0x3a2   : > { %v1632_v27 = vrot.slane %v1624_v29, %v795_v37  ;;  %v1628_v2 = vrot.slane %v1624_v29, %v2629_v33  ;;  %v1640_v38 = vrot.slane %v1624_v29, %v817_v41  ;;  %v1636_v48 = vrot.slane %v1624_v29, %v806_v39 }
 0x3a3   : > { %v1608_v37 = vadd.f32 %v2884_v22, %v1567_v36  ;;  %v1648_v53 = vrot.slane %v1624_v29, %v839_v45  ;;  %v1644_v55 = vrot.slane %v1624_v29, %v828_v43  ;;  %v1652_v23 = vrot.slane %v1624_v29, %v850_v47 }
 0x3a4   : > { %v1667_v30 = vadd.f32 %v1632_v27, %v1606_v25  ;;  %v1665_v34 = vadd.f32 %v1628_v2, %v1604_v46  ;;  %v1671_v44 = vadd.f32 %v1640_v38, %v1610_v40  ;;  %v1656_v60 = vrot.slane %v1624_v29, %v861_v49 }
 0x3a5   : > { %v1669_v52 = vadd.f32 %v1636_v48, %v1608_v37  ;;  %v1675_v54 = vadd.f32 %v1648_v53, %v1614_v26  ;;  %v1673_v57 = vadd.f32 %v1644_v55, %v1612_v56  ;;  %v1677_v59 = vadd.f32 %v1652_v23, %v1616_v58 }
 0x3a6   : > { %v1698_v21 = vadd.f32 %v1689_v32, %v1667_v30  ;;  %v1696_v42 = vadd.f32 %v1689_v32, %v1665_v34  ;;  %v1702_v33 = vadd.f32 %v1689_v32, %v1671_v44  ;;  %v1679_v10 = vadd.f32 %v1656_v60, %v1618_v61 }
 0x3a7   : > { %v1700_v41 = vadd.f32 %v1689_v32, %v1669_v52  ;;  %v1706_v39 = vadd.f32 %v1689_v32, %v1675_v54  ;;  %v1704_v45 = vadd.f32 %v1689_v32, %v1673_v57  ;;  %v1708_v43 = vadd.f32 %v1689_v32, %v1677_v59 }
 0x3a8   : > { %1744 = vperm.xlu0 %2313, %v1698_v21   ;;  %v1710_v62 = vadd.f32 %v1689_v32, %v1679_v10  ;;  %v1607_v47 = vadd.f32 %v2884_v22, %v1564_v13  ;;  %v1666_v35 = vadd.f32 %v1628_v2, %v1605_v3  ;;  %v1611_v49 = vadd.f32 %v2884_v22, %v1576_v14 }
 0x3a9   : > { %v1670_v7 = vadd.f32 %v1636_v48, %v1609_v6  ;;  %v1676_v13 = vadd.f32 %v1648_v53, %v1615_v8  ;;  %v1674_v15 = vadd.f32 %v1644_v55, %v1613_v9  ;;  %v1789_v34 = vadd.s32 4294967288, %v2715_v51 }
 0x3aa   : > { %v1668_v0 = vadd.f32 %v1632_v27, %v1607_v47  ;;  %v1672_v5 = vadd.f32 %v1640_v38, %v1611_v49  ;;  %v1715_v61 = vstv %s2122_s16 }
 0x3ab   : > { %v1792_v40 = vsub.s32 %v1789_v34, %v2624_v28  ;;  %v1716_v3 = vadd.s32 %v1715_v61, %v2624_v28 }
 0x3ac   : > { %1738 = vperm.xlu0 %2313, %v1696_v42   ;;  %v1787_v42 = vsub.s32 %v2715_v51, %v2624_v28 }
 0x3ad   : > { %vm1720_vm8 = vcmp.eq.s32.totalorder %v1716_v3, %v2715_v51 }
 0x3b0   : > { %1756 = vperm.xlu0 %2313, %v1702_v33  }
 0x3b4   : > { %1750 = vperm.xlu0 %2313, %v1700_v41  }
 0x3b8   : > { %1768 = vperm.xlu0 %2313, %v1706_v39  }
 0x3bc   : > { %1762 = vperm.xlu0 %2313, %v1704_v45  }
 0x3c0   : > { %1774 = vperm.xlu0 %2313, %v1708_v43  }
 0x3c4   : > { %1780 = vperm.xlu0 %2313, %v1710_v62  }
 0x3c8   : > { %v1600_v63 = vpop.xlane.xlu1 %1599 }
 0x3c9   : > { %v1619_v17 = vadd.f32 %v2884_v22, %v1600_v63 }
 0x3cb   : > { %v1680_v29 = vadd.f32 %v1656_v60, %v1619_v17 }
 0x3cc   : > { %v1594_v31 = vpop.xlane.xlu1 %1593 }
 0x3cd   : > { %v1617_v36 = vadd.f32 %v2884_v22, %v1594_v31 }
 0x3cf   : > { %v1678_v16 = vadd.f32 %v1652_v23, %v1617_v36 }
 0x3d0   : > { %v1693_v1 = vpop.permute.xlu1 %1692 }
 0x3d1   : > { %v1699_v11 = vadd.f32 %v1693_v1, %v1668_v0  ;;  %v1697_v4 = vadd.f32 %v1693_v1, %v1666_v35  ;;  %v1703_v50 = vadd.f32 %v1693_v1, %v1672_v5  ;;  %v1701_v12 = vadd.f32 %v1693_v1, %v1670_v7 }
 0x3d2   : > { %v1707_v14 = vadd.f32 %v1693_v1, %v1676_v13  ;;  %v1705_v18 = vadd.f32 %v1693_v1, %v1674_v15  ;;  %v1709_v20 = vadd.f32 %v1693_v1, %v1678_v16  ;;  %v1711_v19 = vadd.f32 %v1693_v1, %v1680_v29 }
 0x3d3   : > { %1747 = vperm.xlu1 %2314, %v1699_v11  }
 0x3d7   : > { %1741 = vperm.xlu1 %2314, %v1697_v4  }
 0x3db   : > { %1759 = vperm.xlu1 %2314, %v1703_v50  }
 0x3df   : > { %1753 = vperm.xlu1 %2314, %v1701_v12  }
 0x3e3   : > { %1771 = vperm.xlu1 %2314, %v1707_v14  }
 0x3e7   : > { %1765 = vperm.xlu1 %2314, %v1705_v18  }
 0x3eb   : > { %1777 = vperm.xlu1 %2314, %v1709_v20  }
 0x3ef   : > { %1783 = vperm.xlu1 %2314, %v1711_v19  }
 0x427   : > { %v1745_v25 = vpop.permute.xlu0 %1744 }
 0x428   : > { %v1799_v26 = vrot.slane %v1745_v25, %v1787_v42 }
 0x42b   : > { %v1739_v27 = vpop.permute.xlu0 %1738 }
 0x42c   : > { %v1788_v33 = vrot.slane %v1739_v27, %v1787_v42 }
 0x42f   : > { %v1757_v2 = vpop.permute.xlu0 %1756 }
 0x430   : > { %v1817_v59 = vrot.slane %v1757_v2, %v1787_v42 }
 0x433   : > { %v1751_v24 = vpop.permute.xlu0 %1750 }
 0x434   : > { %v1808_v53 = vrot.slane %v1751_v24, %v1787_v42 }
 0x437   : > { %v1769_v32 = vpop.permute.xlu0 %1768 }
 0x438   : > { %v1835_v11 = vrot.slane %v1769_v32, %v1787_v42 }
 0x43b   : > { %v1763_v22 = vpop.permute.xlu0 %1762 }
 0x43c   : > { %v1826_v58 = vrot.slane %v1763_v22, %v1787_v42 }
 0x43f   : > { %v1775_v54 = vpop.permute.xlu0 %1774 }
 0x440   : > { %v1844_v47 = vrot.slane %v1775_v54, %v1787_v42 }
 0x443   : > { %v1781_v0 = vpop.permute.xlu0 %1780 }
 0x444   : > { %v1853_v5 = vrot.slane %v1781_v0, %v1787_v42 }
 0x452   : > { %v1748_v46 = vpop.permute.xlu1 %1747 }
 0x453   : > { %v1803_v52 = vrot.slane %v1748_v46, %v1792_v40 }
 0x455   : > { %v1804_v39 = vsel %vm1794_vm1, %v1803_v52, %v1799_v26 }
 0x456   : > { %v1742_v30 = vpop.permute.xlu1 %1741 }
 0x457   : > { %v1793_v44 = vrot.slane %v1742_v30, %v1792_v40 }
 0x459   : > { %v1795_v41 = vsel %vm1794_vm1, %v1793_v44, %v1788_v33 }
 0x45a   : > { %v1760_v21 = vpop.permute.xlu1 %1759  ;;  %v1860_v45 = vsel %vm1859_vm14, %v1804_v39, %v1795_v41 }
 0x45b   : > { %v1821_v57 = vrot.slane %v1760_v21, %v1792_v40 }
 0x45d   : > { %v1822_v62 = vsel %vm1794_vm1, %v1821_v57, %v1817_v59 }
 0x45e   : > { %v1754_v38 = vpop.permute.xlu1 %1753 }
 0x45f   : > { %v1812_v48 = vrot.slane %v1754_v38, %v1792_v40 }
 0x461   : > { %v1813_v55 = vsel %vm1794_vm1, %v1812_v48, %v1808_v53 }
 0x462   : > { %v1772_v37 = vpop.permute.xlu1 %1771  ;;  %v1862_v60 = vsel %vm1861_vm2, %v1813_v55, %v1860_v45 }
 0x463   : > { %v1839_v63 = vrot.slane %v1772_v37, %v1792_v40  ;;  %v1864_v1 = vsel %vm1863_vm3, %v1822_v62, %v1862_v60 }
 0x465   : > { %v1840_v6 = vsel %vm1794_vm1, %v1839_v63, %v1835_v11 }
 0x466   : > { %v1766_v56 = vpop.permute.xlu1 %1765 }
 0x467   : > { %v1830_v23 = vrot.slane %v1766_v56, %v1792_v40 }
 0x469   : > { %v1831_v43 = vsel %vm1794_vm1, %v1830_v23, %v1826_v58 }
 0x46a   : > { %v1778_v10 = vpop.permute.xlu1 %1777  ;;  %v1866_v35 = vsel %vm1865_vm4, %v1831_v43, %v1864_v1 }
 0x46b   : > { %v1848_v31 = vrot.slane %v1778_v10, %v1792_v40  ;;  %v1868_v7 = vsel %vm1867_vm5, %v1840_v6, %v1866_v35 }
 0x46d   : > { %v1849_v49 = vsel %vm1794_vm1, %v1848_v31, %v1844_v47 }
 0x46e   : > { %v1784_v4 = vpop.permute.xlu1 %1783  ;;  %v1870_v28 = vsel %vm1869_vm6, %v1849_v49, %v1868_v7 }
 0x46f   : > { %v1857_v50 = vrot.slane %v1784_v4, %v1792_v40 }
 0x471   : > { %v1858_v8 = vsel %vm1794_vm1, %v1857_v50, %v1853_v5 }
 0x472   : > { %v1872_v12 = vsel %vm1871_vm7, %v1858_v8, %v1870_v28 }
 0x473   : > { %v1874_v13 = vsel %vm1720_vm8, 0.0, %v1872_v12 }
 0x474   : > { %1876 = vst.msk [vmem:[%s576_s23] sm:$0xff] %vm1875_vm9, %v1874_v13 }
 0x475   : > { %2333 = shalt.err (!%p2330_p7)
}
 0x476   : > { %s2334_s18 = scalar_lea.hbm %s2947_s25, 128  ;;  %s2338_s29 = scalar_lea.hbm %s3015_s13, 512 }
 0x477   : > { %p2335_p9 = scmp.ne.s32.totalorder %s2947_s25, %s2334_s18  ;;  %p2339_p12 = scmp.lt.u32.totalorder %s2947_s25, %s3015_s13 }
 0x478   : > { %p2340_p13 = scmp.lt.u32.totalorder %s2338_s29, %s2334_s18  ;;  %p2342_p1 = scmp.lt.u32.totalorder %s2334_s18, %s2947_s25 }
 0x479   : > { %p2336_p10 = pnand %p2335_p9, %p2548_p3 }
 0x47a   : > { %p2341_p0 = por %p2340_p13, %p2339_p12 }
 0x47b   : > { %p2337_p11 = pneg %p2336_p10 }
 0x47c   : > { %p2343_p2 = por %p2342_p1, %p2341_p0 }
 0x47e   : > { %p2344_p4 = pnand %p2343_p2, %p2337_p11 }
 0x480   : > { %2347 = shalt.err (!%p2344_p4)
}
 0x481   : > { %2235 = dma.vmem_to_hbm [thread:$0]  (%p2548_p3), %s2949_s27, 128, %s2947_s25, %s1878_s26  }
 0x482 PF: > { %s3037_s23 = sld [smem:[#allocation6_spill]]  ;;  %p2241_p5 = scmp.ge.s32.totalorder %s2414_s17, 2 }
 0x484   : > { %p2238_p6 = pnand %p2241_p5, %p2557_p8 }
 0x488   : > { %s1906_s11 = sand.u32 1, %s3037_s23  }
 0x489   : > { %s1907_s19 = scalar_lea.sflag [#allocation4], %s1906_s11 }
 0x48a   : > { %2381 = dma.done.wait (!%p2238_p6), %s1907_s19, 128  }
 0x48b   : > { %2383 = vsyncadd (!%p2238_p6), %s1907_s19, 4294967168  ;;  %s28_s17 = sadd.s32 1, %s2414_s17   ;;  %s3039_s24 = sld [smem:[#allocation7_spill]] }
 0x48c   : > { %p25_p7 = scmp.ge.s32.totalorder %s28_s17, 6   ;;  %s3040_s29 = sld [smem:[#allocation13_spill]] }
 0x48d   : > { %s3041_s30 = sld [smem:[#allocation8_spill]]  ;;  %s3042_s14 = sld [smem:[#allocation9_spill]] }
 0x48e   : > { %s3043_s15 = sld [smem:[#allocation10_spill]]  ;;  %s3044_s16 = sld [smem:[#allocation11_spill]] }
 0x48f   : > { %s3045_s27 = smov %s2390_s28  ;;  %27 = sbr.rel (!%p25_p7) target bundleno = 8 (0x8), region = 122 }
 0x491   : > { %s3046_s28 = smov %s3039_s24 }
 0x496   :  { %1912 = vsyncpa [#allocation4], 1 }
 0x497   :  { %1914 = vsyncpa [#allocation4 + $0x1], 1 }

</bundles_post_ra>
